<compile_context>
chip_gen: v7x
topology: tpu7x:2x2x1
jax: 0.10.0
libtpu: 0.0.40
codegen_flags: <defaults>
</compile_context>

<pallas_src>
import numpy as np
import jax
import jax.numpy as jnp
from jax import lax
from jax.experimental import pallas as pl
from jax.experimental.pallas import tpu as pltpu


def _round_up(a, m):
    return -(-a // m) * m


def _elu(v):
    # exp only sees the non-positive branch (avoids inf on the masked side).
    return jnp.where(v > 0, v, jnp.exp(jnp.minimum(v, 0.0)) - 1.0)


def _dims(T):
    K1, P1 = T // 2, T // 4
    T1 = T + 2 * P1 - K1 + 1          # after Conv2d(1,4,(1,K1),pad=(0,P1))
    T2 = T1 // 4                      # after AvgPool2d((1,4))
    K3, P3 = T // 4, T // 4
    T3 = T2 + 2 * P3 - K3 + 1         # after Conv2d(8,8,(1,K3),pad=(0,P3))
    T4 = T3 // 8                      # after AvgPool2d((1,8))
    return K1, P1, T1, T2, K3, P3, T3, T4


# -----------------------------------------------------------------------------
# Pallas kernel: one batch tile per grid step; three bf16 MXU matmuls, f32 acc.
# -----------------------------------------------------------------------------
def _eegnet4_kernel(x_ref, m12_ref, b1_ref, m34_ref, b3_ref, p8_ref, out_ref):
    # Cast the f32 input tile to bf16 in-kernel (no wrapper-side pre-cast op);
    # all dots are bf16 x bf16 -> f32 accumulation = one MXU pass per tile.
    x = x_ref[...].astype(jnp.bfloat16)                      # (Bt, C*T)

    # Conv1 + BN1 + grouped spatial Conv2 + BN2, folded into M12 / b1.
    z1 = jnp.dot(x, m12_ref[...],
                 preferred_element_type=jnp.float32) + b1_ref[...]
    h2 = _elu(z1).astype(jnp.bfloat16)                       # (Bt, 8*T1)

    # AvgPool((1,4)) + depthwise Conv3 + 1x1 Conv4 + BN3, folded into M34p / b3.
    z3 = jnp.dot(h2, m34_ref[...],
                 preferred_element_type=jnp.float32) + b3_ref[...]
    h4 = _elu(z3).astype(jnp.bfloat16)                       # (Bt, 8*T3)

    # AvgPool2d((1,8)); Dropout(p=0.25) layers are identity at inference.
    out_ref[...] = jnp.dot(h4, p8_ref[...],
                           preferred_element_type=jnp.float32)


def _choose_batch_tile(B, batch_tile):
    """Sublane-aligned (multiple of 8) batch tile that (a) yields >=2 grid blocks
    whenever B permits (v7x megacore sharding of the 'parallel' axis) and
    (b) prefers a tile dividing B exactly so no wrapper-side pad is needed."""
    upper = max(8, min(batch_tile, _round_up(-(-B // 2), 8)))
    for bt in range(upper, 7, -8):
        if B % bt == 0:
            return bt
    return upper          # ragged batch: last block padded in the wrapper


def eegnet4_forward(x, consts, *, batch_tile=256):
    """x: (B, n_channels, freq_time) float32 -> NCHW (B, 8, 1, T4) float32."""
    B, C, T = x.shape
    m12, b1, m34p, b3, p8 = consts
    CT = C * T
    assert m12.shape[0] == CT
    F1 = m12.shape[1]            # 8*T1
    F3 = m34p.shape[1]           # 8*T3
    F_out = p8.shape[1]          # 8*T4
    T4 = F_out // 8

    Bt = _choose_batch_tile(B, batch_tile)
    n_blocks = -(-B // Bt)
    Bp = n_blocks * Bt

    xf = x.reshape(B, CT).astype(jnp.float32)   # contiguous reshape (no copy)
    if Bp != B:
        # Ragged-batch fallback only; Bt is chosen to divide B whenever possible,
        # so the usual path never pays this extra full-array HBM read/write.
        xf = jnp.pad(xf, ((0, Bp - B), (0, 0)))

    # Scoped-VMEM budget from the actual per-step footprint (+headroom).
    const_bytes = sum(int(np.prod(c.shape)) * c.dtype.itemsize for c in consts)
    tile_bytes = (2 * Bt * CT * 4             # double-buffered x tile (f32)
                  + 2 * Bt * F_out * 4        # double-buffered out tile (f32)
                  + 2 * Bt * (F1 + F3) * 4)   # live f32 intermediates (rough)
    vmem_limit = int(min(96 << 20, max(16 << 20,
                                       4 * (2 * const_bytes + tile_bytes))))

    def call(single_buffer_consts):
        def const_spec(a):
            if single_buffer_consts and hasattr(pl, "Buffered"):
                # Constant index_map -> block never changes; one VMEM buffer is
                # enough (halves constant VMEM vs. default double-buffering).
                return pl.BlockSpec(a.shape, lambda b: (0, 0),
                                    pipeline_mode=pl.Buffered(1))
            return pl.BlockSpec(a.shape, lambda b: (0, 0))

        return pl.pallas_call(
            _eegnet4_kernel,
            out_shape=jax.ShapeDtypeStruct((Bp, F_out), jnp.float32),
            grid=(n_blocks,),
            in_specs=[pl.BlockSpec((Bt, CT), lambda b: (b, 0)),
                      const_spec(m12), const_spec(b1),
                      const_spec(m34p), const_spec(b3), const_spec(p8)],
            out_specs=pl.BlockSpec((Bt, F_out), lambda b: (b, 0)),
            compiler_params=pltpu.CompilerParams(
                dimension_semantics=("parallel",),
                vmem_limit_bytes=vmem_limit),
        )(xf, m12, b1, m34p, b3, p8)

    try:
        out = call(single_buffer_consts=True)
    except Exception:
        # Fallback for jax versions where BlockSpec(pipeline_mode=...) does not
        # lower through the TPU pallas_call pipeline; correctness is identical.
        out = call(single_buffer_consts=False)
    return out[:B].reshape(B, 8, 1, T4)


# -----------------------------------------------------------------------------
# Host-side folding of conv / BN / pooling weights into the kernel constants.
# -----------------------------------------------------------------------------
def build_kernel_constants(params, n_channels, freq):
    C, T = n_channels, freq
    K1, P1, T1, T2, K3, P3, T3, T4 = _dims(T)

    to64 = lambda a: np.asarray(a, np.float64)
    w1 = to64(params["w1"]).reshape(4, K1)
    w2 = to64(params["w2"]).reshape(8, C)
    b2 = to64(params["b2"])
    w3 = to64(params["w3"]).reshape(8, K3)
    b3 = to64(params["b3"])
    w4 = to64(params["w4"]).reshape(8, 8)
    b4 = to64(params["b4"])
    s1, t1 = to64(params["s1"]), to64(params["t1"])
    s2, t2 = to64(params["s2"]), to64(params["t2"])
    s3, t3 = to64(params["s3"]), to64(params["t3"])

    # --- M12: conv1 Toeplitz (zero pad baked in) * BN1 scale, composed with the
    #     grouped spatial conv2 and BN2 scale.  Row layout h*T+j, col o*T1+t. ---
    j_idx = np.arange(T)[:, None]
    t_idx = np.arange(T1)[None, :]
    k_idx = j_idx + P1 - t_idx                               # conv1 tap index
    valid1 = ((k_idx >= 0) & (k_idx < K1)).astype(np.float64)
    toep1 = w1[:, np.clip(k_idx, 0, K1 - 1)] * valid1[None]  # (4, T, T1)
    m12 = np.zeros((C, T, 8, T1), np.float64)
    for o in range(8):
        g = o // 2                            # conv2 group -> conv1 filter
        m12[:, :, o, :] = (w2[o, :, None, None] * (s1[g] * s2[o])) * toep1[g][None]
    m12 = m12.reshape(C * T, 8 * T1)
    # BN1 shift passes through conv2 as a constant; fold conv2 bias + BN2 too.
    bias1 = np.repeat((t1[np.arange(8) // 2] * w2.sum(axis=1) + b2) * s2 + t2, T1)

    # --- P4 / P8: AvgPool2d((1,4)) / ((1,8)) as block-diagonal matrices. ---
    p4 = np.zeros((8, T1, 8, T2), np.float64)
    for o in range(8):
        for u in range(T2):
            p4[o, 4 * u:4 * u + 4, o, u] = 0.25
    p4 = p4.reshape(8 * T1, 8 * T2)

    p8 = np.zeros((8, T3, 8, T4), np.float64)
    for q in range(8):
        for v in range(T4):
            p8[q, 8 * v:8 * v + 8, q, v] = 0.125
    p8 = p8.reshape(8 * T3, 8 * T4)

    # --- M34: depthwise conv3 Toeplitz (pad baked in) composed with the 1x1
    #     conv4 and BN3 scale.  Row layout o*T2+u, col layout q*T3+t. ---
    u_idx = np.arange(T2)[:, None]
    tt_idx = np.arange(T3)[None, :]
    k3_idx = u_idx + P3 - tt_idx
    valid3 = ((k3_idx >= 0) & (k3_idx < K3)).astype(np.float64)
    toep3 = w3[:, np.clip(k3_idx, 0, K3 - 1)] * valid3[None]  # (8, T2, T3)
    m34 = np.zeros((8, T2, 8, T3), np.float64)
    for q in range(8):
        for o in range(8):
            m34[o, :, q, :] = (s3[q] * w4[q, o]) * toep3[o]
    m34 = m34.reshape(8 * T2, 8 * T3)
    bias3 = np.repeat(s3 * (w4 @ b3 + b4) + t3, T3)

    # Fold AvgPool((1,4)) into the second conv stage (removes one matmul and one
    # constant buffer in the kernel).  Matrices go to bf16 (single-pass MXU,
    # half the constant VMEM/DMA bytes); biases stay f32.
    m34p = p4 @ m34                                           # (8*T1, 8*T3)

    bf16 = lambda a: jnp.asarray(a, jnp.bfloat16)
    f32 = lambda a: jnp.asarray(a, jnp.float32)
    return (bf16(m12), f32(bias1.reshape(1, -1)),
            bf16(m34p), f32(bias3.reshape(1, -1)), bf16(p8))


def init_params(key, n_channels, freq):
    """Deterministic synthetic parameters (shapes from EEGNet4.__init__)."""
    K1, K3 = freq // 2, freq // 4
    eps = 1e-5
    keys = jax.random.split(key, 19)
    n = lambda k, shape, s: s * jax.random.normal(k, shape, jnp.float32)

    w1 = n(keys[0], (4, 1, 1, K1), 0.3)            # Conv2d(1,4,(1,K1)), bias=False
    w2 = n(keys[1], (8, 1, n_channels, 1), 0.5)    # Conv2d(4,8,(C,1),groups=4)
    b2 = n(keys[2], (8,), 0.1)
    w3 = n(keys[3], (8, 1, 1, K3), 0.5)            # Conv2d(8,8,(1,K3),groups=8)
    b3 = n(keys[4], (8,), 0.1)
    w4 = n(keys[5], (8, 8, 1, 1), 0.5)             # Conv2d(8,8,(1,1))
    b4 = n(keys[6], (8,), 0.1)

    def bn_fold(kg, kb, km, kv, c):
        gamma = 1.0 + 0.1 * jax.random.normal(kg, (c,), jnp.float32)
        beta = 0.1 * jax.random.normal(kb, (c,), jnp.float32)
        mean = 0.1 * jax.random.normal(km, (c,), jnp.float32)
        var = 1.0 + 0.1 * jnp.abs(jax.random.normal(kv, (c,), jnp.float32))
        s = gamma / jnp.sqrt(var + eps)
        t = beta - mean * s
        return s, t

    s1, t1 = bn_fold(keys[7], keys[8], keys[9], keys[10], 4)
    s2, t2 = bn_fold(keys[11], keys[12], keys[13], keys[14], 8)
    s3, t3 = bn_fold(keys[15], keys[16], keys[17], keys[18], 8)

    return dict(w1=w1, w2=w2, b2=b2, w3=w3, b3=b3, w4=w4, b4=b4,
                s1=s1, t1=t1, s2=s2, t2=t2, s3=s3, t3=t3)


def eegnet4_reference(x, p, freq):
    """Pure-JAX reference mirroring the PyTorch module (NCHW), inference mode."""
    dn = ("NCHW", "OIHW", "NCHW")
    hp = lax.Precision.HIGHEST
    bn = lambda v, s, t: v * s[None, :, None, None] + t[None, :, None, None]

    def avgpool(v, k):
        return lax.reduce_window(v, 0.0, lax.add, (1, 1, 1, k), (1, 1, 1, k),
                                 "VALID") / k

    h = x[:, None, :, :]                                           # unsqueeze
    h = lax.conv_general_dilated(h, p["w1"], (1, 1),
                                 ((0, 0), (freq // 4, freq // 4)),
                                 dimension_numbers=dn, precision=hp)
    h = bn(h, p["s1"], p["t1"])
    h = lax.conv_general_dilated(h, p["w2"], (1, 1), ((0, 0), (0, 0)),
                                 dimension_numbers=dn,
                                 feature_group_count=4, precision=hp)
    h = h + p["b2"][None, :, None, None]
    h = _elu(bn(h, p["s2"], p["t2"]))
    h = avgpool(h, 4)
    h = lax.conv_general_dilated(h, p["w3"], (1, 1),
                                 ((0, 0), (freq // 4, freq // 4)),
                                 dimension_numbers=dn,
                                 feature_group_count=8, precision=hp)
    h = h + p["b3"][None, :, None, None]
    h = lax.conv_general_dilated(h, p["w4"], (1, 1), ((0, 0), (0, 0)),
                                 dimension_numbers=dn, precision=hp)
    h = h + p["b4"][None, :, None, None]
    h = _elu(bn(h, p["s3"], p["t3"]))
    h = avgpool(h, 8)
    return h


if __name__ == "__main__":
    B, C, T = 16, 4, 32      # batch, args.n_channels, args.freq_time
    key = jax.random.PRNGKey(0)
    kx, kp = jax.random.split(key)
    x = jax.random.normal(kx, (B, C, T), jnp.float32)
    params = init_params(kp, C, T)
    consts = build_kernel_constants(params, C, T)

    out = eegnet4_forward(x, consts)
    out = jax.block_until_ready(out)

    ref = eegnet4_reference(x, params, T)
    assert out.shape == ref.shape, (out.shape, ref.shape)
    # Tolerance reflects single-pass bf16 MXU inputs (8-bit mantissa) with f32
    # accumulation over contraction depths of ~128 / ~264.
    np.testing.assert_allclose(np.asarray(out), np.asarray(ref),
                               rtol=2e-2, atol=2e-2)
    print("KERNEL_OK")
</pallas_src>

<mosaic_0001>
module attributes {stable_mosaic.version = 11 : i64} {
  func.func @_eegnet4_kernel(%arg0: i32, %arg1: memref<8x128xf32, #tpu.memory_space<vmem>>, %arg2: memref<128x264xbf16, #tpu.memory_space<vmem>>, %arg3: memref<1x264xf32, #tpu.memory_space<vmem>>, %arg4: memref<264x136xbf16, #tpu.memory_space<vmem>>, %arg5: memref<1x136xf32, #tpu.memory_space<vmem>>, %arg6: memref<136x16xbf16, #tpu.memory_space<vmem>>, %arg7: memref<8x16xf32, #tpu.memory_space<vmem>>) attributes {dimension_semantics = [#tpu.dimension_semantics<parallel>], iteration_bounds = array<i64: 2>, scalar_prefetch = 0 : i64, scratch_operands = 0 : i64, tpu.core_type = #tpu.core_type<tc>, window_params = [{transform_indices = @transform_0, window_bounds = array<i64: 8, 128>}, {pipeline_mode = #tpu.pipeline_mode<synchronous>, transform_indices = @transform_1, window_bounds = array<i64: 128, 264>}, {pipeline_mode = #tpu.pipeline_mode<synchronous>, transform_indices = @transform_2, window_bounds = array<i64: 1, 264>}, {pipeline_mode = #tpu.pipeline_mode<synchronous>, transform_indices = @transform_3, window_bounds = array<i64: 264, 136>}, {pipeline_mode = #tpu.pipeline_mode<synchronous>, transform_indices = @transform_4, window_bounds = array<i64: 1, 136>}, {pipeline_mode = #tpu.pipeline_mode<synchronous>, transform_indices = @transform_5, window_bounds = array<i64: 136, 16>}, {transform_indices = @transform_6, window_bounds = array<i64: 8, 16>}]} {
    %c0 = arith.constant 0 : index
    %c0_0 = arith.constant 0 : index
    %0 = vector.load %arg1[%c0, %c0_0] : memref<8x128xf32, #tpu.memory_space<vmem>>, vector<8x128xf32>
    %1 = arith.truncf %0 : vector<8x128xf32> to vector<8x128xbf16>
    %c0_1 = arith.constant 0 : index
    %c0_2 = arith.constant 0 : index
    %2 = vector.load %arg2[%c0_1, %c0_2] : memref<128x264xbf16, #tpu.memory_space<vmem>>, vector<128x264xbf16>
    %cst = arith.constant dense<0.000000e+00> : vector<8x264xf32>
    %3 = tpu.matmul %1, %2, %cst {dimension_numbers = #tpu.dot_dimension_numbers<[1], [0], [0], [1], [0, 0, 1, 1], [], []>} : vector<8x128xbf16>, vector<128x264xbf16>, vector<8x264xf32> -> vector<8x264xf32>
    %c0_3 = arith.constant 0 : index
    %c0_4 = arith.constant 0 : index
    %4 = vector.load %arg3[%c0_3, %c0_4] : memref<1x264xf32, #tpu.memory_space<vmem>>, vector<1x264xf32>
    %5 = vector.broadcast %4 : vector<1x264xf32> to vector<8x264xf32>
    %6 = arith.addf %3, %5 : vector<8x264xf32>
    %cst_5 = arith.constant 0.000000e+00 : f32
    %7 = vector.broadcast %cst_5 : f32 to vector<8x264xf32>
    %8 = arith.cmpf ogt, %6, %7 : vector<8x264xf32>
    %cst_6 = arith.constant 0.000000e+00 : f32
    %9 = vector.broadcast %cst_6 : f32 to vector<8x264xf32>
    %10 = arith.minimumf %6, %9 : vector<8x264xf32>
    %11 = math.exp %10 : vector<8x264xf32>
    %cst_7 = arith.constant 1.000000e+00 : f32
    %12 = vector.broadcast %cst_7 : f32 to vector<8x264xf32>
    %13 = arith.subf %11, %12 : vector<8x264xf32>
    %14 = arith.select %8, %6, %13 : vector<8x264xi1>, vector<8x264xf32>
    %15 = arith.truncf %14 : vector<8x264xf32> to vector<8x264xbf16>
    %c0_8 = arith.constant 0 : index
    %c0_9 = arith.constant 0 : index
    %16 = vector.load %arg4[%c0_8, %c0_9] : memref<264x136xbf16, #tpu.memory_space<vmem>>, vector<264x136xbf16>
    %cst_10 = arith.constant dense<0.000000e+00> : vector<8x136xf32>
    %17 = tpu.matmul %15, %16, %cst_10 {dimension_numbers = #tpu.dot_dimension_numbers<[1], [0], [0], [1], [0, 0, 1, 1], [], []>} : vector<8x264xbf16>, vector<264x136xbf16>, vector<8x136xf32> -> vector<8x136xf32>
    %c0_11 = arith.constant 0 : index
    %c0_12 = arith.constant 0 : index
    %18 = vector.load %arg5[%c0_11, %c0_12] : memref<1x136xf32, #tpu.memory_space<vmem>>, vector<1x136xf32>
    %19 = vector.broadcast %18 : vector<1x136xf32> to vector<8x136xf32>
    %20 = arith.addf %17, %19 : vector<8x136xf32>
    %cst_13 = arith.constant 0.000000e+00 : f32
    %21 = vector.broadcast %cst_13 : f32 to vector<8x136xf32>
    %22 = arith.cmpf ogt, %20, %21 : vector<8x136xf32>
    %cst_14 = arith.constant 0.000000e+00 : f32
    %23 = vector.broadcast %cst_14 : f32 to vector<8x136xf32>
    %24 = arith.minimumf %20, %23 : vector<8x136xf32>
    %25 = math.exp %24 : vector<8x136xf32>
    %cst_15 = arith.constant 1.000000e+00 : f32
    %26 = vector.broadcast %cst_15 : f32 to vector<8x136xf32>
    %27 = arith.subf %25, %26 : vector<8x136xf32>
    %28 = arith.select %22, %20, %27 : vector<8x136xi1>, vector<8x136xf32>
    %29 = arith.truncf %28 : vector<8x136xf32> to vector<8x136xbf16>
    %c0_16 = arith.constant 0 : index
    %c0_17 = arith.constant 0 : index
    %30 = vector.load %arg6[%c0_16, %c0_17] : memref<136x16xbf16, #tpu.memory_space<vmem>>, vector<136x16xbf16>
    %cst_18 = arith.constant dense<0.000000e+00> : vector<8x16xf32>
    %31 = tpu.matmul %29, %30, %cst_18 {dimension_numbers = #tpu.dot_dimension_numbers<[1], [0], [0], [1], [0, 0, 1, 1], [], []>} : vector<8x136xbf16>, vector<136x16xbf16>, vector<8x16xf32> -> vector<8x16xf32>
    %c0_19 = arith.constant 0 : index
    %c0_20 = arith.constant 0 : index
    %32 = vector.load %arg7[%c0_19, %c0_20] : memref<8x16xf32, #tpu.memory_space<vmem>>, vector<8x16xf32>
    tpu.vector_store %arg7[%c0_19, %c0_20], %31 {strides = array<i32>} : memref<8x16xf32, #tpu.memory_space<vmem>>, vector<8x16xf32>,
    return
  }
  func.func @transform_0(%arg0: i32) -> (i32, i32) {
    %c0_i32 = arith.constant 0 : i32
    %c0_i32_0 = arith.constant 0 : i32
    return %arg0, %c0_i32 : i32, i32
  }
  func.func @transform_1(%arg0: i32) -> (i32, i32) {
    %c0_i32 = arith.constant 0 : i32
    %c0_i32_0 = arith.constant 0 : i32
    %c0_i32_1 = arith.constant 0 : i32
    return %c0_i32, %c0_i32_0 : i32, i32
  }
  func.func @transform_2(%arg0: i32) -> (i32, i32) {
    %c0_i32 = arith.constant 0 : i32
    %c0_i32_0 = arith.constant 0 : i32
    %c0_i32_1 = arith.constant 0 : i32
    return %c0_i32, %c0_i32_0 : i32, i32
  }
  func.func @transform_3(%arg0: i32) -> (i32, i32) {
    %c0_i32 = arith.constant 0 : i32
    %c0_i32_0 = arith.constant 0 : i32
    %c0_i32_1 = arith.constant 0 : i32
    return %c0_i32, %c0_i32_0 : i32, i32
  }
  func.func @transform_4(%arg0: i32) -> (i32, i32) {
    %c0_i32 = arith.constant 0 : i32
    %c0_i32_0 = arith.constant 0 : i32
    %c0_i32_1 = arith.constant 0 : i32
    return %c0_i32, %c0_i32_0 : i32, i32
  }
  func.func @transform_5(%arg0: i32) -> (i32, i32) {
    %c0_i32 = arith.constant 0 : i32
    %c0_i32_0 = arith.constant 0 : i32
    %c0_i32_1 = arith.constant 0 : i32
    return %c0_i32, %c0_i32_0 : i32, i32
  }
  func.func @transform_6(%arg0: i32) -> (i32, i32) {
    %c0_i32 = arith.constant 0 : i32
    %c0_i32_0 = arith.constant 0 : i32
    return %arg0, %c0_i32 : i32, i32
  }
}

module attributes {stable_mosaic.version = 11 : i64} {
  func.func @_eegnet4_kernel(%arg0: i32, %arg1: memref<8x128xf32, #tpu.memory_space<vmem>>, %arg2: memref<128x264xbf16, #tpu.memory_space<vmem>>, %arg3: memref<1x264xf32, #tpu.memory_space<vmem>>, %arg4: memref<264x136xbf16, #tpu.memory_space<vmem>>, %arg5: memref<1x136xf32, #tpu.memory_space<vmem>>, %arg6: memref<136x16xbf16, #tpu.memory_space<vmem>>, %arg7: memref<8x16xf32, #tpu.memory_space<vmem>>) attributes {dimension_semantics = [#tpu.dimension_semantics<parallel>], iteration_bounds = array<i64: 2>, scalar_prefetch = 0 : i64, scratch_operands = 0 : i64, tpu.core_type = #tpu.core_type<tc>, window_params = [{transform_indices = @transform_0, window_bounds = array<i64: 8, 128>}, {pipeline_mode = #tpu.pipeline_mode<synchronous>, transform_indices = @transform_1, window_bounds = array<i64: 128, 264>}, {pipeline_mode = #tpu.pipeline_mode<synchronous>, transform_indices = @transform_2, window_bounds = array<i64: 1, 264>}, {pipeline_mode = #tpu.pipeline_mode<synchronous>, transform_indices = @transform_3, window_bounds = array<i64: 264, 136>}, {pipeline_mode = #tpu.pipeline_mode<synchronous>, transform_indices = @transform_4, window_bounds = array<i64: 1, 136>}, {pipeline_mode = #tpu.pipeline_mode<synchronous>, transform_indices = @transform_5, window_bounds = array<i64: 136, 16>}, {transform_indices = @transform_6, window_bounds = array<i64: 8, 16>}]} {
    %c0 = arith.constant 0 : index
    %c0_0 = arith.constant 0 : index
    %0 = vector.load %arg1[%c0, %c0_0] : memref<8x128xf32, #tpu.memory_space<vmem>>, vector<8x128xf32>
    %1 = arith.truncf %0 : vector<8x128xf32> to vector<8x128xbf16>
    %c0_1 = arith.constant 0 : index
    %c0_2 = arith.constant 0 : index
    %2 = vector.load %arg2[%c0_1, %c0_2] : memref<128x264xbf16, #tpu.memory_space<vmem>>, vector<128x264xbf16>
    %cst = arith.constant dense<0.000000e+00> : vector<8x264xf32>
    %3 = tpu.matmul %1, %2, %cst {dimension_numbers = #tpu.dot_dimension_numbers<[1], [0], [0], [1], [0, 0, 1, 1], [], []>} : vector<8x128xbf16>, vector<128x264xbf16>, vector<8x264xf32> -> vector<8x264xf32>
    %c0_3 = arith.constant 0 : index
    %c0_4 = arith.constant 0 : index
    %4 = vector.load %arg3[%c0_3, %c0_4] : memref<1x264xf32, #tpu.memory_space<vmem>>, vector<1x264xf32>
    %5 = vector.broadcast %4 : vector<1x264xf32> to vector<8x264xf32>
    %6 = arith.addf %3, %5 : vector<8x264xf32>
    %cst_5 = arith.constant 0.000000e+00 : f32
    %7 = vector.broadcast %cst_5 : f32 to vector<8x264xf32>
    %8 = arith.cmpf ogt, %6, %7 : vector<8x264xf32>
    %cst_6 = arith.constant 0.000000e+00 : f32
    %9 = vector.broadcast %cst_6 : f32 to vector<8x264xf32>
    %10 = arith.minimumf %6, %9 : vector<8x264xf32>
    %11 = math.exp %10 : vector<8x264xf32>
    %cst_7 = arith.constant 1.000000e+00 : f32
    %12 = vector.broadcast %cst_7 : f32 to vector<8x264xf32>
    %13 = arith.subf %11, %12 : vector<8x264xf32>
    %14 = arith.select %8, %6, %13 : vector<8x264xi1>, vector<8x264xf32>
    %15 = arith.truncf %14 : vector<8x264xf32> to vector<8x264xbf16>
    %c0_8 = arith.constant 0 : index
    %c0_9 = arith.constant 0 : index
    %16 = vector.load %arg4[%c0_8, %c0_9] : memref<264x136xbf16, #tpu.memory_space<vmem>>, vector<264x136xbf16>
    %cst_10 = arith.constant dense<0.000000e+00> : vector<8x136xf32>
    %17 = tpu.matmul %15, %16, %cst_10 {dimension_numbers = #tpu.dot_dimension_numbers<[1], [0], [0], [1], [0, 0, 1, 1], [], []>} : vector<8x264xbf16>, vector<264x136xbf16>, vector<8x136xf32> -> vector<8x136xf32>
    %c0_11 = arith.constant 0 : index
    %c0_12 = arith.constant 0 : index
    %18 = vector.load %arg5[%c0_11, %c0_12] : memref<1x136xf32, #tpu.memory_space<vmem>>, vector<1x136xf32>
    %19 = vector.broadcast %18 : vector<1x136xf32> to vector<8x136xf32>
    %20 = arith.addf %17, %19 : vector<8x136xf32>
    %cst_13 = arith.constant 0.000000e+00 : f32
    %21 = vector.broadcast %cst_13 : f32 to vector<8x136xf32>
    %22 = arith.cmpf ogt, %20, %21 : vector<8x136xf32>
    %cst_14 = arith.constant 0.000000e+00 : f32
    %23 = vector.broadcast %cst_14 : f32 to vector<8x136xf32>
    %24 = arith.minimumf %20, %23 : vector<8x136xf32>
    %25 = math.exp %24 : vector<8x136xf32>
    %cst_15 = arith.constant 1.000000e+00 : f32
    %26 = vector.broadcast %cst_15 : f32 to vector<8x136xf32>
    %27 = arith.subf %25, %26 : vector<8x136xf32>
    %28 = arith.select %22, %20, %27 : vector<8x136xi1>, vector<8x136xf32>
    %29 = arith.truncf %28 : vector<8x136xf32> to vector<8x136xbf16>
    %c0_16 = arith.constant 0 : index
    %c0_17 = arith.constant 0 : index
    %30 = vector.load %arg6[%c0_16, %c0_17] : memref<136x16xbf16, #tpu.memory_space<vmem>>, vector<136x16xbf16>
    %cst_18 = arith.constant dense<0.000000e+00> : vector<8x16xf32>
    %31 = tpu.matmul %29, %30, %cst_18 {dimension_numbers = #tpu.dot_dimension_numbers<[1], [0], [0], [1], [0, 0, 1, 1], [], []>} : vector<8x136xbf16>, vector<136x16xbf16>, vector<8x16xf32> -> vector<8x16xf32>
    %c0_19 = arith.constant 0 : index
    %c0_20 = arith.constant 0 : index
    %32 = vector.load %arg7[%c0_19, %c0_20] : memref<8x16xf32, #tpu.memory_space<vmem>>, vector<8x16xf32>
    tpu.vector_store %arg7[%c0_19, %c0_20], %31 {strides = array<i32>} : memref<8x16xf32, #tpu.memory_space<vmem>>, vector<8x16xf32>,
    return
  }
  func.func @transform_0(%arg0: i32) -> (i32, i32) {
    %c0_i32 = arith.constant 0 : i32
    %c0_i32_0 = arith.constant 0 : i32
    return %arg0, %c0_i32 : i32, i32
  }
  func.func @transform_1(%arg0: i32) -> (i32, i32) {
    %c0_i32 = arith.constant 0 : i32
    %c0_i32_0 = arith.constant 0 : i32
    %c0_i32_1 = arith.constant 0 : i32
    return %c0_i32, %c0_i32_0 : i32, i32
  }
  func.func @transform_2(%arg0: i32) -> (i32, i32) {
    %c0_i32 = arith.constant 0 : i32
    %c0_i32_0 = arith.constant 0 : i32
    %c0_i32_1 = arith.constant 0 : i32
    return %c0_i32, %c0_i32_0 : i32, i32
  }
  func.func @transform_3(%arg0: i32) -> (i32, i32) {
    %c0_i32 = arith.constant 0 : i32
    %c0_i32_0 = arith.constant 0 : i32
    %c0_i32_1 = arith.constant 0 : i32
    return %c0_i32, %c0_i32_0 : i32, i32
  }
  func.func @transform_4(%arg0: i32) -> (i32, i32) {
    %c0_i32 = arith.constant 0 : i32
    %c0_i32_0 = arith.constant 0 : i32
    %c0_i32_1 = arith.constant 0 : i32
    return %c0_i32, %c0_i32_0 : i32, i32
  }
  func.func @transform_5(%arg0: i32) -> (i32, i32) {
    %c0_i32 = arith.constant 0 : i32
    %c0_i32_0 = arith.constant 0 : i32
    %c0_i32_1 = arith.constant 0 : i32
    return %c0_i32, %c0_i32_0 : i32, i32
  }
  func.func @transform_6(%arg0: i32) -> (i32, i32) {
    %c0_i32 = arith.constant 0 : i32
    %c0_i32_0 = arith.constant 0 : i32
    return %arg0, %c0_i32 : i32, i32
  }
}

</mosaic_0001>

<bundles_post_ra>
// kernel: tpu_custom_call.1
= control target key start
LH: loop header
LB: loop body
LE: loop exit
PB: predicated region body
PF: predicated region fallthrough
CT: control target
= control target key end

     0   :  { %11 = vsyncpa [#allocation3], 0  ;;  %s1732_s0 = inlined_call_operand.vmem [shape: f32[16,128], index: 0, kind: input, shape index: {}]   ;;  %s1733_s1 = inlined_call_operand.vmem [shape: bf16[128,264], index: 1, kind: input, shape index: {}]   ;;  %s1734_s2 = inlined_call_operand.vmem [shape: f32[1,264], index: 2, kind: input, shape index: {}]   ;;  %s1735_s3 = inlined_call_operand.vmem [shape: bf16[264,136], index: 3, kind: input, shape index: {}]   ;;  %s1736_s4 = inlined_call_operand.vmem [shape: f32[1,136], index: 4, kind: input, shape index: {}]   ;;  %s1737_s5 = inlined_call_operand.vmem [shape: bf16[136,16], index: 5, kind: input, shape index: {}]   ;;  %s1738_s6 = inlined_call_operand.hbm [shape: f32[16,16], index: 6, kind: output, shape index: {}]  }
   0x1   :  { %13 = vsyncpa [#allocation3 + $0x1], 0  ;;  %s1399_s21 = smov 0   ;;  %s1401_s22 = smov 0  }
   0x2   :  { %s1403_s23 = smov 0   ;;  %s1405_s24 = smov 0  }
   0x3 LB: > { %s1420_s25 = sadd.s32 4294967295, %s1358_s24   ;;  %s1035_s26 = sadd.s32 4294967294, %s1358_s24   ;;  %s1358_s24 = sphi %s1405_s24, %s1744_s24   ;;  %s1354_s23 = sphi %s1403_s23, %s1743_s23   ;;  %s1350_s22 = sphi %s1401_s22, %s1742_s22   ;;  %s1346_s21 = sphi %s1399_s21, %s1741_s21  }
   0x4   : > { %s1424_s27 = sadd.s32 1, %s1358_s24   ;;  %s157_s28 = sadd.s32 1, %s1354_s23 }
   0x5   : > { %s154_s29 = ssub.s32 %s1358_s24, %s1424_s27  ;;  %p167_p0 = scmp.ne.s32.totalorder %s1354_s23, %s1350_s22 }
   0x6   : > { %p155_p1 = scmp.eq.s32.totalorder %s154_s29, 0  ;;  %p168_p2 = scmp.eq.s32.totalorder %s1420_s25, 1 }
   0x7   : > { %p173_p3 = scmp.ne.s32.totalorder %s1350_s22, %s1346_s21  ;;  %p174_p4 = scmp.eq.s32.totalorder %s1035_s26, 1 }
   0x8   : > { %s1435_s30 = scalar_select %p155_p1, %s1354_s23, %s157_s28  }
   0x9   : > { %p1437_p5 = por %p168_p2, %p167_p0  ;;  %p1441_p6 = por %p174_p4, %p173_p3 }
   0xa   : > { %p1038_p7 = scmp.ge.s32.totalorder %s1358_s24, 1  ;;  %p214_p8 = scmp.lt.s32.totalorder %s1358_s24, 3 }
   0xc   : > { %p215_p9 = pnand %p1038_p7, %p214_p8 }
   0xd   : > { %v1195_v0 = vld [vmem:[%s1733_s1 + $0x4] ss:$12 sps:$4 sm:$0xff] (!%p215_p9)   ;;  %v1360_v1 = vmov (!%p215_p9), 0.0   ;;  %v1197_v2 = vld [vmem:[%s1733_s1 + $0x8] ss:$12 sps:$4 sm:$0xff] (!%p215_p9)   ;;  %vm1361_vm0 = vmmov (!%p215_p9), 0  }
   0xe   : > { %218 = sbr.rel (%p215_p9) target bundleno = 748 (0x2ec), region = 44  ;;  %1129 = vmatprep.subr.bf16.mxu1 (!%p215_p9), %v1360_v1  ;;  %1145 = vmatprep.mubr.msk.bf16.mxu1 (!%p215_p9), %vm1361_vm0, %v1360_v1  ;;  %v1198_v3 = vld [vmem:[%s1733_s1] ss:$12 sps:$4 sm:$0xff] (!%p215_p9)   ;;  %v1199_v4 = vld [vmem:[%s1733_s1 + $0x1c] ss:$12 sps:$4 sm:$0xff] (!%p215_p9)   ;;  %v1362_v5 = vmov (!%p215_p9), 0  }
   0xf   : > { %427 = vmatprep.subr.bf16.mxu0 (!%p215_p9), %v1195_v0  ;;  %1130 = vmatpush3.bf16.msra.mxu1 (!%p215_p9), %v1197_v2  ;;  %v1201_v6 = vld [vmem:[%s1733_s1 + $0x20] ss:$12 sps:$4 sm:$0xff] (!%p215_p9)   ;;  %v1202_v7 = vld [vmem:[%s1733_s1 + $0x18] ss:$12 sps:$4 sm:$0xff] (!%p215_p9)   ;;  %v1206_v10 = vld [vmem:[%s1733_s1 + $0x30] ss:$12 sps:$4 sm:$0xff] (!%p215_p9)   ;;  %v284_v0 = vlaneseq (!%p215_p9) }
  0x10   : > { %459 = vmatprep.mubr.bf16.mxu0 (!%p215_p9), %v1362_v5  ;;  %428 = vmatpush1.bf16.msra.mxu0 (!%p215_p9), %v1198_v3  ;;  %v1203_v8 = vld [vmem:[%s1733_s1 + $0x34] ss:$12 sps:$4 sm:$0xff] (!%p215_p9)   ;;  %v1205_v9 = vld [vmem:[%s1733_s1 + $0x38] ss:$12 sps:$4 sm:$0xff] (!%p215_p9)   ;;  %v1209_v12 = vld [vmem:[%s1733_s1 + $0x50] ss:$12 sps:$4 sm:$0xff] (!%p215_p9)  }
  0x11   : > { %1131 = vmatprep.subr.bf16.mxu1 (!%p215_p9), %v1360_v1  ;;  %429 = vmatprep.subr.bf16.mxu0 (!%p215_p9), %v1199_v4  ;;  %v1207_v11 = vld [vmem:[%s1733_s1 + $0x4c] ss:$12 sps:$4 sm:$0xff] (!%p215_p9)   ;;  %v1210_v13 = vld [vmem:[%s1733_s1 + $0x48] ss:$12 sps:$4 sm:$0xff] (!%p215_p9)   ;;  %p243_p10 = scmp.lt.s32.totalorder (!%p215_p9), %s1420_s25, 1  ;;  %v561_v57 = vld [vmem:[%s1735_s3 + $0x100] sm:$0xff] (!%p215_p9) }
  0x12   : > { %v1211_v14 = vld [vmem:[%s1733_s1 + $0x64] ss:$12 sps:$4 sm:$0xff] (!%p215_p9)   ;;  %v1213_v15 = vld [vmem:[%s1733_s1 + $0x68] ss:$12 sps:$4 sm:$0xff] (!%p215_p9)   ;;  %v1214_v16 = vld [vmem:[%s1733_s1 + $0x60] ss:$12 sps:$4 sm:$0xff] (!%p215_p9)   ;;  %v1101_v59 = vcombine.high (!%p215_p9), %v561_v57, %v561_v57  ;;  %v1100_v60 = vcombine.low (!%p215_p9), %v561_v57, %v561_v57 }
  0x13   : > { %1132 = vmatpush3.bf16.msra.mxu1 (!%p215_p9), %v1201_v6  ;;  %v1215_v17 = vld [vmem:[%s1733_s1 + $0x7c] ss:$12 sps:$4 sm:$0xff] (!%p215_p9)   ;;  %v1217_v18 = vld [vmem:[%s1733_s1 + $0x80] ss:$12 sps:$4 sm:$0xff] (!%p215_p9)   ;;  %v1218_v19 = vld [vmem:[%s1733_s1 + $0x78] ss:$12 sps:$4 sm:$0xff] (!%p215_p9)  }
  0x14   : > { %430 = vmatpush1.bf16.msra.mxu0 (!%p215_p9), %v1202_v7  ;;  %1133 = vmatprep.subr.bf16.mxu1 (!%p215_p9), %v1360_v1  ;;  %v1219_v20 = vld [vmem:[%s1733_s1 + $0x94] ss:$12 sps:$4 sm:$0xff] (!%p215_p9)   ;;  %v1221_v21 = vld [vmem:[%s1733_s1 + $0x98] ss:$12 sps:$4 sm:$0xff] (!%p215_p9)   ;;  %v1222_v22 = vld [vmem:[%s1733_s1 + $0x90] ss:$12 sps:$4 sm:$0xff] (!%p215_p9)  }
  0x15   : > { %431 = vmatprep.subr.bf16.mxu0 %v1203_v8  ;;  %s244_s9 = scalar_select %p243_p10, %s1420_s25, 1  ;;  %v1223_v23 = vld [vmem:[%s1733_s1 + $0xac] ss:$12 sps:$4 sm:$0xff]   ;;  %v1225_v24 = vld [vmem:[%s1733_s1 + $0xb0] ss:$12 sps:$4 sm:$0xff]   ;;  %vm743_vm1 = vcmask 1043456  }
  0x16   : > { %v1226_v26 = vld [vmem:[%s1733_s1 + $0xa8] ss:$12 sps:$4 sm:$0xff]   ;;  %v1229_v27 = vld [vmem:[%s1735_s3 + $0x4] ss:$8 sps:$4 sm:$0xff]   ;;  %v1230_v31 = vld [vmem:[%s1735_s3 + $0x10] ss:$8 sps:$4 sm:$0xff]  }
  0x17   : > { %1134 = vmatpush3.bf16.msra.mxu1 %v1205_v9  ;;  %s1040_s18 = sshll.u32 %s244_s9, 3  ;;  %v1227_v29 = vld [vmem:[%s1735_s3] ss:$8 sps:$4 sm:$0xff]   ;;  %v1232_v30 = vld [vmem:[%s1735_s3 + $0x14] ss:$8 sps:$4 sm:$0xff]   ;;  %v745_v61 = vsel %vm743_vm1, %v1100_v60, 0 }
  0x18   : > { %432 = vmatpush1.bf16.msra.mxu0 %v1206_v10  ;;  %1135 = vmatprep.subr.bf16.mxu1 %v1360_v1  ;;  %s246_s11 = scalar_lea.vmem %s1732_s0, %s1040_s18  ;;  %v1235_v32 = vld [vmem:[%s1735_s3 + $0x24] ss:$8 sps:$4 sm:$0xff]   ;;  %v1233_v33 = vld [vmem:[%s1735_s3 + $0x20] ss:$8 sps:$4 sm:$0xff]   ;;  %v1238_v34 = vld [vmem:[%s1735_s3 + $0x34] ss:$8 sps:$4 sm:$0xff]  }
  0x19   : > { %433 = vmatprep.subr.bf16.mxu0 %v1207_v11  ;;  %v248_v25 = vld [vmem:[%s246_s11] sm:$0xff]  ;;  %v1236_v35 = vld [vmem:[%s1735_s3 + $0x30] ss:$8 sps:$4 sm:$0xff]   ;;  %v1244_v38 = vld [vmem:[%s1735_s3 + $0x54] ss:$8 sps:$4 sm:$0xff]   ;;  %vm739_vm4 = vcmask 64512  }
  0x1a   : > { %v249_v28 = vpack.c.bf16 %v248_v25, %v248_v25  ;;  %v1241_v36 = vld [vmem:[%s1735_s3 + $0x44] ss:$8 sps:$4 sm:$0xff]   ;;  %v1239_v37 = vld [vmem:[%s1735_s3 + $0x40] ss:$8 sps:$4 sm:$0xff]   ;;  %v1242_v39 = vld [vmem:[%s1735_s3 + $0x50] ss:$8 sps:$4 sm:$0xff]  }
  0x1b   : > { %1136 = vmatpush3.bf16.msra.mxu1 %v1209_v12  ;;  %v1247_v40 = vld [vmem:[%s1735_s3 + $0x64] ss:$8 sps:$4 sm:$0xff]   ;;  %v1245_v41 = vld [vmem:[%s1735_s3 + $0x60] ss:$8 sps:$4 sm:$0xff]   ;;  %v1250_v42 = vld [vmem:[%s1735_s3 + $0x74] ss:$8 sps:$4 sm:$0xff]  }
  0x1c   : > { %434 = vmatpush1.bf16.msra.mxu0 %v1210_v13  ;;  %1137 = vmatprep.subr.bf16.mxu1 %v1360_v1  ;;  %v1248_v43 = vld [vmem:[%s1735_s3 + $0x70] ss:$8 sps:$4 sm:$0xff]   ;;  %v1253_v44 = vld [vmem:[%s1735_s3 + $0x84] ss:$8 sps:$4 sm:$0xff]   ;;  %v1251_v45 = vld [vmem:[%s1735_s3 + $0x80] ss:$8 sps:$4 sm:$0xff]  }
  0x1d   : > { %435 = vmatprep.subr.bf16.mxu0 %v1211_v14  ;;  %v1256_v46 = vld [vmem:[%s1735_s3 + $0x94] ss:$8 sps:$4 sm:$0xff]   ;;  %v1254_v47 = vld [vmem:[%s1735_s3 + $0x90] ss:$8 sps:$4 sm:$0xff]   ;;  %v1259_v48 = vld [vmem:[%s1735_s3 + $0xa4] ss:$8 sps:$4 sm:$0xff]  }
  0x1e   : > { %v1257_v49 = vld [vmem:[%s1735_s3 + $0xa0] ss:$8 sps:$4 sm:$0xff]   ;;  %v1262_v50 = vld [vmem:[%s1735_s3 + $0xb4] ss:$8 sps:$4 sm:$0xff]   ;;  %v1260_v51 = vld [vmem:[%s1735_s3 + $0xb0] ss:$8 sps:$4 sm:$0xff]  }
  0x1f   : > { %1138 = vmatpush3.bf16.msra.mxu1 %v1213_v15  ;;  %v1265_v52 = vld [vmem:[%s1735_s3 + $0xc4] ss:$8 sps:$4 sm:$0xff]   ;;  %v1263_v53 = vld [vmem:[%s1735_s3 + $0xc0] ss:$8 sps:$4 sm:$0xff]   ;;  %v1268_v54 = vld [vmem:[%s1735_s3 + $0xd4] ss:$8 sps:$4 sm:$0xff]  }
  0x20   : > { %436 = vmatpush1.bf16.msra.mxu0 %v1214_v16  ;;  %1139 = vmatprep.subr.bf16.mxu1 %v1360_v1  ;;  %v1266_v55 = vld [vmem:[%s1735_s3 + $0xd0] ss:$8 sps:$4 sm:$0xff]   ;;  %v1271_v56 = vld [vmem:[%s1735_s3 + $0xe4] ss:$8 sps:$4 sm:$0xff]   ;;  %v1269_v58 = vld [vmem:[%s1735_s3 + $0xe0] ss:$8 sps:$4 sm:$0xff]  }
  0x21   : > { %437 = vmatprep.subr.bf16.mxu0 %v1215_v17  ;;  %v1276_v62 = vld [vmem:[%s1735_s3 + $0xf4] ss:$8 sps:$4 sm:$0xff]   ;;  %v1274_v63 = vld [vmem:[%s1735_s3 + $0xf0] ss:$8 sps:$4 sm:$0xff]   ;;  %v282_v3 = vld [vmem:[%s1734_s2] sm:$0x7] }
  0x22   : > { %s240_s15 = sand.u32 1, %s1350_s22   ;;  %s1117_s17 = sshll.u32 %s1420_s25, 7  ;;  %vm960_vm8 = vcmask 130048  }
  0x23   : > { %1140 = vmatpush3.bf16.msra.mxu1 %v1217_v18  ;;  %s1039_s16 = sshll.u32 %s240_s15, 3  ;;  %s1690_s28 = scalar_lea.hbm %s1738_s6, %s1117_s17 }
  0x24   : > { %438 = vmatpush1.bf16.msra.mxu0 %v1218_v19  ;;  %1141 = vmatprep.subr.bf16.mxu1 %v1360_v1  ;;  %s242_s18 = scalar_lea.vmem [#allocation2], %s1039_s16  ;;  %s963_s29 = scalar_lea.sflag [#allocation3], %s240_s15 }
  0x25   : > { %439 = vmatprep.subr.bf16.mxu0 %v1219_v20  ;;  %s976_s19 = sshll.u32 %s242_s18, 4  ;;  %s1363_s25 = smov [#allocation2]   ;;  %s1692_s19 = int_to_ptr.vmem [resolvable:$true] %s976_s19 }
  0x26   : > { %s1296_s10 = scalar_lea.vmem %s1692_s19, 128  ;;  %s1300_s11 = sshll.u32 %s1363_s25, 4  ;;  %s1301_s11 = int_to_ptr.vmem [resolvable:$false] %s1300_s11 }
  0x27   : > { %1142 = vmatpush3.bf16.msra.mxu1 %v1221_v21  ;;  %p1297_p11 = scmp.ne.s32.totalorder %s1692_s19, %s1296_s10  ;;  %s1302_s12 = scalar_lea.vmem %s1301_s11, 256 }
  0x28   : > { %440 = vmatpush1.bf16.msra.mxu0 %v1222_v22  ;;  %1143 = vmatprep.subr.bf16.mxu1 %v1360_v1  ;;  %v1628_v1 = vshrl.u32 %v284_v0, 7  ;;  %p1303_p0 = scmp.lt.s32.totalorder %s1692_s19, %s1301_s11  ;;  %p1304_p1 = scmp.lt.s32.totalorder %s1302_s12, %s1296_s10 }
  0x29   : > { %441 = vmatprep.subr.bf16.mxu0 %v1223_v23  ;;  %p1298_p12 = pnand %p1297_p11, %p1437_p5 }
  0x2a   : > { %v294_v2 = vsub.s32 2, %v1628_v1  ;;  %v286_v4 = vsub.s32 0, %v1628_v1  ;;  %v290_v6 = vsub.s32 1, %v1628_v1  ;;  %p1305_p2 = por %p1304_p1, %p1303_p0 }
  0x2b   : > { %1144 = vmatpush3.bf16.msra.mxu1 %v1225_v24  ;;  %p1299_p13 = pneg %p1298_p12 }
  0x2c   : > { %442 = vmatpush1.bf16.msra.mxu0 %v1226_v26  ;;  %1102 = vmatprep.subr.msk.bf16.mxu1 %vm743_vm1, %v1101_v59  ;;  %v295_v7 = vrot.slane %v282_v3, %v294_v2  ;;  %v287_v8 = vrot.slane %v282_v3, %v286_v4  ;;  %v291_v9 = vrot.slane %v282_v3, %v290_v6 }
  0x2d   : > { %750 = vmatprep.subr.bf16.mxu0 %v1229_v27  ;;  %p1306_p3 = pnand %p1305_p2, %p1299_p13 }
  0x2e   : > { %1146 = vmatmul.mubr.bf16.vlgmr.msra.gmra.mrb[0].mxu1 %v249_v28 }
  0x2f   : > { %460 = vmatmul.mubr.bf16.vlgmr.msra.gmra.mrb[0].mxu0 %v249_v28  ;;  %823 = vmatprep.mubr.bf16.mxu1 %v1362_v5 }
  0x30   : > { %751 = vmatpush1.bf16.msra.mxu0 %v1227_v29  ;;  %792 = vmatpush1.bf16.msra.mxu1 %v745_v61 }
  0x31   : > { %752 = vmatprep.subr.bf16.mxu0 %v1232_v30  ;;  %920 = vmatprep.subr.bf16.mxu1 %v1362_v5 }
  0x34   : > { %753 = vmatpush1.bf16.msra.mxu0 %v1230_v31 }
  0x35   : > { %754 = vmatprep.subr.bf16.mxu0 %v1235_v32 }
  0x38   : > { %755 = vmatpush1.bf16.msra.mxu0 %v1233_v33 }
  0x39   : > { %756 = vmatprep.subr.bf16.mxu0 %v1238_v34  ;;  %v1277_v34 = vld [vmem:[%s1737_s5] sm:$0xff]  }
  0x3c   : > { %757 = vmatpush1.bf16.msra.mxu0 %v1236_v35 }
  0x3d   : > { %758 = vmatprep.subr.bf16.mxu0 %v1241_v36 }
  0x40   : > { %759 = vmatpush1.bf16.msra.mxu0 %v1239_v37 }
  0x41   : > { %760 = vmatprep.subr.bf16.mxu0 %v1244_v38 }
  0x44   : > { %761 = vmatpush1.bf16.msra.mxu0 %v1242_v39 }
  0x45   : > { %762 = vmatprep.subr.bf16.mxu0 %v1247_v40  ;;  %v1278_v40 = vld [vmem:[%s1737_s5 + $0x8] sm:$0xff]  }
  0x48   : > { %763 = vmatpush1.bf16.msra.mxu0 %v1245_v41  ;;  %v1279_v41 = vld [vmem:[%s1737_s5 + $0x10] sm:$0xff]  }
  0x49   : > { %764 = vmatprep.subr.bf16.mxu0 %v1250_v42  ;;  %v1280_v42 = vld [vmem:[%s1737_s5 + $0x18] sm:$0xff]  }
  0x4c   : > { %765 = vmatpush1.bf16.msra.mxu0 %v1248_v43  ;;  %v1281_v43 = vld [vmem:[%s1737_s5 + $0x20] sm:$0xff]  }
  0x4d   : > { %766 = vmatprep.subr.bf16.mxu0 %v1253_v44  ;;  %v1282_v44 = vld [vmem:[%s1737_s5 + $0x28] sm:$0xff]  }
  0x50   : > { %767 = vmatpush1.bf16.msra.mxu0 %v1251_v45  ;;  %v1283_v45 = vld [vmem:[%s1737_s5 + $0x30] sm:$0xff]  }
  0x51   : > { %768 = vmatprep.subr.bf16.mxu0 %v1256_v46  ;;  %v1284_v46 = vld [vmem:[%s1737_s5 + $0x38] sm:$0xff]  }
  0x54   : > { %769 = vmatpush1.bf16.msra.mxu0 %v1254_v47  ;;  %v1285_v47 = vld [vmem:[%s1737_s5 + $0x40] ss:$0 sps:$4 sm:$0xff]  }
  0x55   : > { %770 = vmatprep.subr.bf16.mxu0 %v1259_v48  ;;  %v918_v48 = vsel %vm743_vm1, %v1285_v47, 0 }
  0x58   : > { %771 = vmatpush1.bf16.msra.mxu0 %v1257_v49  ;;  %v562_v49 = vld [vmem:[%s1736_s4] sm:$0x3] }
  0x59   : > { %772 = vmatprep.subr.bf16.mxu0 %v1262_v50 }
  0x5c   : > { %773 = vmatpush1.bf16.msra.mxu0 %v1260_v51  ;;  %v567_v51 = vrot.slane %v562_v49, %v286_v4 }
  0x5d   : > { %774 = vmatprep.subr.bf16.mxu0 %v1265_v52 }
  0x60   : > { %775 = vmatpush1.bf16.msra.mxu0 %v1263_v53  ;;  %v571_v53 = vrot.slane %v562_v49, %v290_v6 }
  0x61   : > { %776 = vmatprep.subr.bf16.mxu0 %v1268_v54 }
  0x64   : > { %777 = vmatpush1.bf16.msra.mxu0 %v1266_v55 }
  0x65   : > { %778 = vmatprep.subr.bf16.mxu0 %v1271_v56 }
  0x68   : > { %779 = vmatpush1.bf16.msra.mxu0 %v1269_v58 }
  0x69   : > { %780 = vmatprep.subr.bf16.mxu0 %v1276_v62 }
  0x6c   : > { %781 = vmatpush1.bf16.msra.mxu0 %v1274_v63 }
 0x101   : > { %v502_v10 = vpop.f32.mrb[0].mxu1 }
 0x102   : > { %v503_v11 = vadd.f32 %v502_v10, %v295_v7  ;;  %v461_v12 = vpop.f32.mrb[0].mxu0  ;;  %v1147_v13 = vpop.f32.mrb[1].mxu1 }
 0x103   : > { %v462_v14 = vadd.f32 %v461_v12, %v287_v8  ;;  %v463_v15 = vpop.f32.mrb[1].mxu0  ;;  %v505_v16 = vpop.f32.mrb[2].mxu1 }
 0x104   : > { %v513_v17 = vmin.f32 %v503_v11, 0.0  ;;  %v464_v18 = vadd.f32 %v463_v15, %v291_v9  ;;  %v465_v19 = vpop.f32.mrb[2].mxu0  ;;  %v1148_v20 = vpop.f32.mrb[3].mxu1  ;;  %vm510_vm2 = vcmp.gt.f32.partialorder %v503_v11, 0.0 }
 0x105   : > { %v511_v21 = vmin.f32 %v462_v14, 0.0  ;;  %v466_v22 = vpop.f32.mrb[3].mxu0  ;;  %vm508_vm3 = vcmp.gt.f32.partialorder %v462_v14, 0.0 }
 0x106   : > { %v518_v23 = vmul.f32 1.442695, %v513_v17  ;;  %v512_v24 = vmin.f32 %v464_v18, 0.0  ;;  %vm509_vm5 = vcmp.gt.f32.partialorder %v464_v18, 0.0 }
 0x107   : > { %v514_v25 = vmul.f32 1.442695, %v511_v21 }
 0x108   : > { %1286 = vpow2.f32 %v518_v23  ;;  %v516_v26 = vmul.f32 1.442695, %v512_v24 }
 0x109   : > { %1288 = vpow2.f32 %v514_v25 }
 0x10a   : > { %1290 = vpow2.f32 %v516_v26 }
 0x112   : > { %v1287_v27 = vpop.eup %1286 }
 0x113   : > { %v1289_v28 = vpop.eup %1288  ;;  %v1067_v29 = vadd.f32 -1.0, %v1287_v27 }
 0x114   : > { %v1291_v30 = vpop.eup %1290  ;;  %v1065_v31 = vadd.f32 -1.0, %v1289_v28 }
 0x115   : > { %v525_v32 = vsel %vm510_vm2, %v503_v11, %v1067_v29  ;;  %v1066_v33 = vadd.f32 -1.0, %v1291_v30 }
 0x116   : > { %v528_v35 = vpack.c.bf16 %v525_v32, %v525_v32  ;;  %v523_v36 = vsel %vm508_vm3, %v462_v14, %v1065_v31 }
 0x117   : > { %v524_v37 = vsel %vm509_vm5, %v464_v18, %v1066_v33  ;;  %v526_v39 = vpack.c.bf16 %v523_v36, %v523_v36 }
 0x118   : > { %1103 = vmatmul.mubr.msk.bf16.vlgmr.msra.gmra.mrb[4].mxu1 %vm739_vm4, %v528_v35  ;;  %v527_v38 = vpack.c.bf16 %v524_v37, %v524_v37 }
 0x119   : > { %921 = vmatpush1.bf16.msra.mxu1 %v1277_v34 }
 0x11a   : > { %782 = vmatprep.mubr.bf16.mxu0 %v527_v38  ;;  %922 = vmatprep.subr.bf16.mxu1 %v1362_v5 }
 0x11b   : > { %783 = vmatmul.mubr.bf16.vlgmr.msra.gmra.mrb[4].mxu0 %v526_v39 }
 0x11d   : > { %923 = vmatpush1.bf16.msra.mxu1 %v1278_v40 }
 0x11e   : > { %924 = vmatprep.subr.bf16.mxu1 %v1362_v5 }
 0x121   : > { %925 = vmatpush1.bf16.msra.mxu1 %v1279_v41 }
 0x122   : > { %926 = vmatprep.subr.bf16.mxu1 %v1362_v5 }
 0x125   : > { %927 = vmatpush1.bf16.msra.mxu1 %v1280_v42 }
 0x126   : > { %928 = vmatprep.subr.bf16.mxu1 %v1362_v5 }
 0x129   : > { %929 = vmatpush1.bf16.msra.mxu1 %v1281_v43 }
 0x12a   : > { %930 = vmatprep.subr.bf16.mxu1 %v1362_v5 }
 0x12d   : > { %931 = vmatpush1.bf16.msra.mxu1 %v1282_v44 }
 0x12e   : > { %932 = vmatprep.subr.bf16.mxu1 %v1362_v5 }
 0x131   : > { %933 = vmatpush1.bf16.msra.mxu1 %v1283_v45 }
 0x132   : > { %934 = vmatprep.subr.bf16.mxu1 %v1362_v5 }
 0x135   : > { %935 = vmatpush1.bf16.msra.mxu1 %v1284_v46 }
 0x136   : > { %936 = vmatprep.subr.bf16.mxu1 %v1362_v5 }
 0x139   : > { %937 = vmatpush1.bf16.msra.mxu1 %v918_v48 }
 0x1eb   : > { %v825_v50 = vpop.f32.mrb[4].mxu1 }
 0x1ec   : > { %v827_v52 = vpop.f32.mrb[5].mxu1 }
 0x1ed   : > { %v829_v5 = vpop.f32.mrb[6].mxu1 }
 0x1ee   : > { %v784_v54 = vpop.f32.mrb[4].mxu0  ;;  %v830_v55 = vpop.f32.mrb[7].mxu1 }
 0x1ef   : > { %v785_v56 = vadd.f32 %v784_v54, %v567_v51  ;;  %v786_v57 = vpop.f32.mrb[5].mxu0 }
 0x1f0   : > { %v787_v58 = vadd.f32 %v786_v57, %v571_v53  ;;  %v788_v59 = vpop.f32.mrb[6].mxu0 }
 0x1f1   : > { %v826_v60 = vadd.f32 %v825_v50, %v785_v56  ;;  %v789_v61 = vpop.f32.mrb[7].mxu0 }
 0x1f2   : > { %v828_v62 = vadd.f32 %v827_v52, %v787_v58 }
 0x1f3   : > { %v834_v63 = vmin.f32 %v826_v60, 0.0  ;;  %vm832_vm6 = vcmp.gt.f32.partialorder %v826_v60, 0.0 }
 0x1f4   : > { %v835_v0 = vmin.f32 %v828_v62, 0.0  ;;  %vm833_vm7 = vcmp.gt.f32.partialorder %v828_v62, 0.0 }
 0x1f5   : > { %v836_v2 = vmul.f32 1.442695, %v834_v63 }
 0x1f6   : > { %v838_v3 = vmul.f32 1.442695, %v835_v0 }
 0x1f7   : > { %1292 = vpow2.f32 %v836_v2 }
 0x1f8   : > { %1294 = vpow2.f32 %v838_v3 }
 0x201   : > { %v1293_v1 = vpop.eup %1292 }
 0x202   : > { %v1295_v4 = vpop.eup %1294  ;;  %v1104_v6 = vadd.f32 -1.0, %v1293_v1 }
 0x203   : > { %v1105_v7 = vadd.f32 -1.0, %v1295_v4 }
 0x204   : > { %v842_v8 = vsel %vm832_vm6, %v826_v60, %v1104_v6 }
 0x205   : > { %v843_v9 = vsel %vm833_vm7, %v828_v62, %v1105_v7  ;;  %v844_v11 = vpack.c.bf16 %v842_v8, %v842_v8 }
 0x206   : > { %v845_v10 = vpack.c.bf16 %v843_v9, %v843_v9 }
 0x208   : > { %1115 = vmatprep.mubr.msk.bf16.mxu1 %vm739_vm4, %v845_v10 }
 0x209   : > { %953 = vmatmul.mubr.bf16.vlgmr.msra.gmra.mrb[8].mxu1 %v844_v11 }
 0x2dc   : > { %v954_v12 = vpop.f32.mrb[8].mxu1 }
 0x2dd   : > { %961 = vst.msk [vmem:[%s242_s18] sm:$0xff] %vm960_vm8, %v954_v12  ;;  %v956_v13 = vpop.f32.mrb[9].mxu1 }
 0x2de   : > { %v957_v14 = vpop.f32.mrb[10].mxu1 }
 0x2df   : > { %1309 = shalt.err (!%p1306_p3)
}
 0x2e0   : > { %s1310_s13 = scalar_lea.hbm %s1690_s28, 128  ;;  %s1314_s15 = scalar_lea.hbm %s1738_s6, 256 }
 0x2e1   : > { %p1311_p4 = scmp.ne.s32.totalorder %s1690_s28, %s1310_s13  ;;  %p1315_p9 = scmp.lt.u32.totalorder %s1690_s28, %s1738_s6 }
 0x2e2   : > { %p1316_p10 = scmp.lt.u32.totalorder %s1314_s15, %s1310_s13  ;;  %p1318_p12 = scmp.lt.u32.totalorder %s1310_s13, %s1690_s28 }
 0x2e3   : > { %p1312_p7 = pnand %p1311_p4, %p1437_p5 }
 0x2e4   : > { %p1317_p11 = por %p1316_p10, %p1315_p9 }
 0x2e5   : > { %p1313_p8 = pneg %p1312_p7 }
 0x2e6   : > { %p1319_p13 = por %p1318_p12, %p1317_p11 }
 0x2e8   : > { %p1320_p0 = pnand %p1319_p13, %p1313_p8 }
 0x2ea   : > { %1323 = shalt.err (!%p1320_p0)
}
 0x2eb   : > { %1153 = dma.vmem_to_hbm [thread:$0]  (%p1437_p5), %s1692_s19, 128, %s1690_s28, %s963_s29   ;;  %v958_v15 = vpop.f32.mrb[11].mxu1 }
 0x2ec PF: > { %p1159_p1 = scmp.ge.s32.totalorder %s1358_s24, 2  ;;  %s988_s18 = sand.u32 1, %s1346_s21  }
 0x2ed   : > { %s989_s20 = scalar_lea.sflag [#allocation3], %s988_s18 }
 0x2ee   : > { %p1156_p2 = pnand %p1159_p1, %p1441_p6 }
 0x2f0   : > { %1341 = dma.done.wait (!%p1156_p2), %s989_s20, 128  }
 0x2f1   : > { %1343 = vsyncadd (!%p1156_p2), %s989_s20, 4294967168  ;;  %p16_p3 = scmp.ge.s32.totalorder %s1424_s27, 4   ;;  %s1741_s21 = smov %s1350_s22 }
 0x2f2   : > { %s1742_s22 = smov %s1354_s23  ;;  %s1743_s23 = smov %s1435_s30 }
 0x2f3   : > { %s1744_s24 = smov %s1424_s27  ;;  %18 = sbr.rel (!%p16_p3) target bundleno = 3 (0x3), region = 79 }
 0x2fa   :  { %994 = vsyncpa [#allocation3], 1 }
 0x2fb   :  { %996 = vsyncpa [#allocation3 + $0x1], 1 }

// kernel: tpu_custom_call.1
= control target key start
LH: loop header
LB: loop body
LE: loop exit
PB: predicated region body
PF: predicated region fallthrough
CT: control target
= control target key end

     0   :  { %11 = vsyncpa [#allocation3], 0  ;;  %s1732_s0 = inlined_call_operand.vmem [shape: f32[16,128], index: 0, kind: input, shape index: {}]   ;;  %s1733_s1 = inlined_call_operand.vmem [shape: bf16[128,264], index: 1, kind: input, shape index: {}]   ;;  %s1734_s2 = inlined_call_operand.vmem [shape: f32[1,264], index: 2, kind: input, shape index: {}]   ;;  %s1735_s3 = inlined_call_operand.vmem [shape: bf16[264,136], index: 3, kind: input, shape index: {}]   ;;  %s1736_s4 = inlined_call_operand.vmem [shape: f32[1,136], index: 4, kind: input, shape index: {}]   ;;  %s1737_s5 = inlined_call_operand.vmem [shape: bf16[136,16], index: 5, kind: input, shape index: {}]   ;;  %s1738_s6 = inlined_call_operand.hbm [shape: f32[16,16], index: 6, kind: output, shape index: {}]  }
   0x1   :  { %13 = vsyncpa [#allocation3 + $0x1], 0  ;;  %s1399_s21 = smov 0   ;;  %s1401_s22 = smov 0  }
   0x2   :  { %s1403_s23 = smov 0   ;;  %s1405_s24 = smov 0  }
   0x3 LB: > { %s1420_s25 = sadd.s32 4294967295, %s1358_s24   ;;  %s1035_s26 = sadd.s32 4294967294, %s1358_s24   ;;  %s1358_s24 = sphi %s1405_s24, %s1744_s24   ;;  %s1354_s23 = sphi %s1403_s23, %s1743_s23   ;;  %s1350_s22 = sphi %s1401_s22, %s1742_s22   ;;  %s1346_s21 = sphi %s1399_s21, %s1741_s21  }
   0x4   : > { %s1424_s27 = sadd.s32 1, %s1358_s24   ;;  %s157_s28 = sadd.s32 1, %s1354_s23 }
   0x5   : > { %s154_s29 = ssub.s32 %s1358_s24, %s1424_s27  ;;  %p167_p0 = scmp.ne.s32.totalorder %s1354_s23, %s1350_s22 }
   0x6   : > { %p155_p1 = scmp.eq.s32.totalorder %s154_s29, 0  ;;  %p168_p2 = scmp.eq.s32.totalorder %s1420_s25, 1 }
   0x7   : > { %p173_p3 = scmp.ne.s32.totalorder %s1350_s22, %s1346_s21  ;;  %p174_p4 = scmp.eq.s32.totalorder %s1035_s26, 1 }
   0x8   : > { %s1435_s30 = scalar_select %p155_p1, %s1354_s23, %s157_s28  }
   0x9   : > { %p1437_p5 = por %p168_p2, %p167_p0  ;;  %p1441_p6 = por %p174_p4, %p173_p3 }
   0xa   : > { %p1038_p7 = scmp.ge.s32.totalorder %s1358_s24, 1  ;;  %p214_p8 = scmp.lt.s32.totalorder %s1358_s24, 3 }
   0xc   : > { %p215_p9 = pnand %p1038_p7, %p214_p8 }
   0xd   : > { %v1195_v0 = vld [vmem:[%s1733_s1 + $0x4] ss:$12 sps:$4 sm:$0xff] (!%p215_p9)   ;;  %v1360_v1 = vmov (!%p215_p9), 0.0   ;;  %v1197_v2 = vld [vmem:[%s1733_s1 + $0x8] ss:$12 sps:$4 sm:$0xff] (!%p215_p9)   ;;  %vm1361_vm0 = vmmov (!%p215_p9), 0  }
   0xe   : > { %218 = sbr.rel (%p215_p9) target bundleno = 748 (0x2ec), region = 44  ;;  %1129 = vmatprep.subr.bf16.mxu1 (!%p215_p9), %v1360_v1  ;;  %1145 = vmatprep.mubr.msk.bf16.mxu1 (!%p215_p9), %vm1361_vm0, %v1360_v1  ;;  %v1198_v3 = vld [vmem:[%s1733_s1] ss:$12 sps:$4 sm:$0xff] (!%p215_p9)   ;;  %v1199_v4 = vld [vmem:[%s1733_s1 + $0x1c] ss:$12 sps:$4 sm:$0xff] (!%p215_p9)   ;;  %v1362_v5 = vmov (!%p215_p9), 0  }
   0xf   : > { %427 = vmatprep.subr.bf16.mxu0 (!%p215_p9), %v1195_v0  ;;  %1130 = vmatpush3.bf16.msra.mxu1 (!%p215_p9), %v1197_v2  ;;  %v1201_v6 = vld [vmem:[%s1733_s1 + $0x20] ss:$12 sps:$4 sm:$0xff] (!%p215_p9)   ;;  %v1202_v7 = vld [vmem:[%s1733_s1 + $0x18] ss:$12 sps:$4 sm:$0xff] (!%p215_p9)   ;;  %v1206_v10 = vld [vmem:[%s1733_s1 + $0x30] ss:$12 sps:$4 sm:$0xff] (!%p215_p9)   ;;  %v284_v0 = vlaneseq (!%p215_p9) }
  0x10   : > { %459 = vmatprep.mubr.bf16.mxu0 (!%p215_p9), %v1362_v5  ;;  %428 = vmatpush1.bf16.msra.mxu0 (!%p215_p9), %v1198_v3  ;;  %v1203_v8 = vld [vmem:[%s1733_s1 + $0x34] ss:$12 sps:$4 sm:$0xff] (!%p215_p9)   ;;  %v1205_v9 = vld [vmem:[%s1733_s1 + $0x38] ss:$12 sps:$4 sm:$0xff] (!%p215_p9)   ;;  %v1209_v12 = vld [vmem:[%s1733_s1 + $0x50] ss:$12 sps:$4 sm:$0xff] (!%p215_p9)  }
  0x11   : > { %1131 = vmatprep.subr.bf16.mxu1 (!%p215_p9), %v1360_v1  ;;  %429 = vmatprep.subr.bf16.mxu0 (!%p215_p9), %v1199_v4  ;;  %v1207_v11 = vld [vmem:[%s1733_s1 + $0x4c] ss:$12 sps:$4 sm:$0xff] (!%p215_p9)   ;;  %v1210_v13 = vld [vmem:[%s1733_s1 + $0x48] ss:$12 sps:$4 sm:$0xff] (!%p215_p9)   ;;  %p243_p10 = scmp.lt.s32.totalorder (!%p215_p9), %s1420_s25, 1  ;;  %v561_v57 = vld [vmem:[%s1735_s3 + $0x100] sm:$0xff] (!%p215_p9) }
  0x12   : > { %v1211_v14 = vld [vmem:[%s1733_s1 + $0x64] ss:$12 sps:$4 sm:$0xff] (!%p215_p9)   ;;  %v1213_v15 = vld [vmem:[%s1733_s1 + $0x68] ss:$12 sps:$4 sm:$0xff] (!%p215_p9)   ;;  %v1214_v16 = vld [vmem:[%s1733_s1 + $0x60] ss:$12 sps:$4 sm:$0xff] (!%p215_p9)   ;;  %v1101_v59 = vcombine.high (!%p215_p9), %v561_v57, %v561_v57  ;;  %v1100_v60 = vcombine.low (!%p215_p9), %v561_v57, %v561_v57 }
  0x13   : > { %1132 = vmatpush3.bf16.msra.mxu1 (!%p215_p9), %v1201_v6  ;;  %v1215_v17 = vld [vmem:[%s1733_s1 + $0x7c] ss:$12 sps:$4 sm:$0xff] (!%p215_p9)   ;;  %v1217_v18 = vld [vmem:[%s1733_s1 + $0x80] ss:$12 sps:$4 sm:$0xff] (!%p215_p9)   ;;  %v1218_v19 = vld [vmem:[%s1733_s1 + $0x78] ss:$12 sps:$4 sm:$0xff] (!%p215_p9)  }
  0x14   : > { %430 = vmatpush1.bf16.msra.mxu0 (!%p215_p9), %v1202_v7  ;;  %1133 = vmatprep.subr.bf16.mxu1 (!%p215_p9), %v1360_v1  ;;  %v1219_v20 = vld [vmem:[%s1733_s1 + $0x94] ss:$12 sps:$4 sm:$0xff] (!%p215_p9)   ;;  %v1221_v21 = vld [vmem:[%s1733_s1 + $0x98] ss:$12 sps:$4 sm:$0xff] (!%p215_p9)   ;;  %v1222_v22 = vld [vmem:[%s1733_s1 + $0x90] ss:$12 sps:$4 sm:$0xff] (!%p215_p9)  }
  0x15   : > { %431 = vmatprep.subr.bf16.mxu0 %v1203_v8  ;;  %s244_s9 = scalar_select %p243_p10, %s1420_s25, 1  ;;  %v1223_v23 = vld [vmem:[%s1733_s1 + $0xac] ss:$12 sps:$4 sm:$0xff]   ;;  %v1225_v24 = vld [vmem:[%s1733_s1 + $0xb0] ss:$12 sps:$4 sm:$0xff]   ;;  %vm743_vm1 = vcmask 1043456  }
  0x16   : > { %v1226_v26 = vld [vmem:[%s1733_s1 + $0xa8] ss:$12 sps:$4 sm:$0xff]   ;;  %v1229_v27 = vld [vmem:[%s1735_s3 + $0x4] ss:$8 sps:$4 sm:$0xff]   ;;  %v1230_v31 = vld [vmem:[%s1735_s3 + $0x10] ss:$8 sps:$4 sm:$0xff]  }
  0x17   : > { %1134 = vmatpush3.bf16.msra.mxu1 %v1205_v9  ;;  %s1040_s18 = sshll.u32 %s244_s9, 3  ;;  %v1227_v29 = vld [vmem:[%s1735_s3] ss:$8 sps:$4 sm:$0xff]   ;;  %v1232_v30 = vld [vmem:[%s1735_s3 + $0x14] ss:$8 sps:$4 sm:$0xff]   ;;  %v745_v61 = vsel %vm743_vm1, %v1100_v60, 0 }
  0x18   : > { %432 = vmatpush1.bf16.msra.mxu0 %v1206_v10  ;;  %1135 = vmatprep.subr.bf16.mxu1 %v1360_v1  ;;  %s246_s11 = scalar_lea.vmem %s1732_s0, %s1040_s18  ;;  %v1235_v32 = vld [vmem:[%s1735_s3 + $0x24] ss:$8 sps:$4 sm:$0xff]   ;;  %v1233_v33 = vld [vmem:[%s1735_s3 + $0x20] ss:$8 sps:$4 sm:$0xff]   ;;  %v1238_v34 = vld [vmem:[%s1735_s3 + $0x34] ss:$8 sps:$4 sm:$0xff]  }
  0x19   : > { %433 = vmatprep.subr.bf16.mxu0 %v1207_v11  ;;  %v248_v25 = vld [vmem:[%s246_s11] sm:$0xff]  ;;  %v1236_v35 = vld [vmem:[%s1735_s3 + $0x30] ss:$8 sps:$4 sm:$0xff]   ;;  %v1244_v38 = vld [vmem:[%s1735_s3 + $0x54] ss:$8 sps:$4 sm:$0xff]   ;;  %vm739_vm4 = vcmask 64512  }
  0x1a   : > { %v249_v28 = vpack.c.bf16 %v248_v25, %v248_v25  ;;  %v1241_v36 = vld [vmem:[%s1735_s3 + $0x44] ss:$8 sps:$4 sm:$0xff]   ;;  %v1239_v37 = vld [vmem:[%s1735_s3 + $0x40] ss:$8 sps:$4 sm:$0xff]   ;;  %v1242_v39 = vld [vmem:[%s1735_s3 + $0x50] ss:$8 sps:$4 sm:$0xff]  }
  0x1b   : > { %1136 = vmatpush3.bf16.msra.mxu1 %v1209_v12  ;;  %v1247_v40 = vld [vmem:[%s1735_s3 + $0x64] ss:$8 sps:$4 sm:$0xff]   ;;  %v1245_v41 = vld [vmem:[%s1735_s3 + $0x60] ss:$8 sps:$4 sm:$0xff]   ;;  %v1250_v42 = vld [vmem:[%s1735_s3 + $0x74] ss:$8 sps:$4 sm:$0xff]  }
  0x1c   : > { %434 = vmatpush1.bf16.msra.mxu0 %v1210_v13  ;;  %1137 = vmatprep.subr.bf16.mxu1 %v1360_v1  ;;  %v1248_v43 = vld [vmem:[%s1735_s3 + $0x70] ss:$8 sps:$4 sm:$0xff]   ;;  %v1253_v44 = vld [vmem:[%s1735_s3 + $0x84] ss:$8 sps:$4 sm:$0xff]   ;;  %v1251_v45 = vld [vmem:[%s1735_s3 + $0x80] ss:$8 sps:$4 sm:$0xff]  }
  0x1d   : > { %435 = vmatprep.subr.bf16.mxu0 %v1211_v14  ;;  %v1256_v46 = vld [vmem:[%s1735_s3 + $0x94] ss:$8 sps:$4 sm:$0xff]   ;;  %v1254_v47 = vld [vmem:[%s1735_s3 + $0x90] ss:$8 sps:$4 sm:$0xff]   ;;  %v1259_v48 = vld [vmem:[%s1735_s3 + $0xa4] ss:$8 sps:$4 sm:$0xff]  }
  0x1e   : > { %v1257_v49 = vld [vmem:[%s1735_s3 + $0xa0] ss:$8 sps:$4 sm:$0xff]   ;;  %v1262_v50 = vld [vmem:[%s1735_s3 + $0xb4] ss:$8 sps:$4 sm:$0xff]   ;;  %v1260_v51 = vld [vmem:[%s1735_s3 + $0xb0] ss:$8 sps:$4 sm:$0xff]  }
  0x1f   : > { %1138 = vmatpush3.bf16.msra.mxu1 %v1213_v15  ;;  %v1265_v52 = vld [vmem:[%s1735_s3 + $0xc4] ss:$8 sps:$4 sm:$0xff]   ;;  %v1263_v53 = vld [vmem:[%s1735_s3 + $0xc0] ss:$8 sps:$4 sm:$0xff]   ;;  %v1268_v54 = vld [vmem:[%s1735_s3 + $0xd4] ss:$8 sps:$4 sm:$0xff]  }
  0x20   : > { %436 = vmatpush1.bf16.msra.mxu0 %v1214_v16  ;;  %1139 = vmatprep.subr.bf16.mxu1 %v1360_v1  ;;  %v1266_v55 = vld [vmem:[%s1735_s3 + $0xd0] ss:$8 sps:$4 sm:$0xff]   ;;  %v1271_v56 = vld [vmem:[%s1735_s3 + $0xe4] ss:$8 sps:$4 sm:$0xff]   ;;  %v1269_v58 = vld [vmem:[%s1735_s3 + $0xe0] ss:$8 sps:$4 sm:$0xff]  }
  0x21   : > { %437 = vmatprep.subr.bf16.mxu0 %v1215_v17  ;;  %v1276_v62 = vld [vmem:[%s1735_s3 + $0xf4] ss:$8 sps:$4 sm:$0xff]   ;;  %v1274_v63 = vld [vmem:[%s1735_s3 + $0xf0] ss:$8 sps:$4 sm:$0xff]   ;;  %v282_v3 = vld [vmem:[%s1734_s2] sm:$0x7] }
  0x22   : > { %s240_s15 = sand.u32 1, %s1350_s22   ;;  %s1117_s17 = sshll.u32 %s1420_s25, 7  ;;  %vm960_vm8 = vcmask 130048  }
  0x23   : > { %1140 = vmatpush3.bf16.msra.mxu1 %v1217_v18  ;;  %s1039_s16 = sshll.u32 %s240_s15, 3  ;;  %s1690_s28 = scalar_lea.hbm %s1738_s6, %s1117_s17 }
  0x24   : > { %438 = vmatpush1.bf16.msra.mxu0 %v1218_v19  ;;  %1141 = vmatprep.subr.bf16.mxu1 %v1360_v1  ;;  %s242_s18 = scalar_lea.vmem [#allocation2], %s1039_s16  ;;  %s963_s29 = scalar_lea.sflag [#allocation3], %s240_s15 }
  0x25   : > { %439 = vmatprep.subr.bf16.mxu0 %v1219_v20  ;;  %s976_s19 = sshll.u32 %s242_s18, 4  ;;  %s1363_s25 = smov [#allocation2]   ;;  %s1692_s19 = int_to_ptr.vmem [resolvable:$true] %s976_s19 }
  0x26   : > { %s1296_s10 = scalar_lea.vmem %s1692_s19, 128  ;;  %s1300_s11 = sshll.u32 %s1363_s25, 4  ;;  %s1301_s11 = int_to_ptr.vmem [resolvable:$false] %s1300_s11 }
  0x27   : > { %1142 = vmatpush3.bf16.msra.mxu1 %v1221_v21  ;;  %p1297_p11 = scmp.ne.s32.totalorder %s1692_s19, %s1296_s10  ;;  %s1302_s12 = scalar_lea.vmem %s1301_s11, 256 }
  0x28   : > { %440 = vmatpush1.bf16.msra.mxu0 %v1222_v22  ;;  %1143 = vmatprep.subr.bf16.mxu1 %v1360_v1  ;;  %v1628_v1 = vshrl.u32 %v284_v0, 7  ;;  %p1303_p0 = scmp.lt.s32.totalorder %s1692_s19, %s1301_s11  ;;  %p1304_p1 = scmp.lt.s32.totalorder %s1302_s12, %s1296_s10 }
  0x29   : > { %441 = vmatprep.subr.bf16.mxu0 %v1223_v23  ;;  %p1298_p12 = pnand %p1297_p11, %p1437_p5 }
  0x2a   : > { %v294_v2 = vsub.s32 2, %v1628_v1  ;;  %v286_v4 = vsub.s32 0, %v1628_v1  ;;  %v290_v6 = vsub.s32 1, %v1628_v1  ;;  %p1305_p2 = por %p1304_p1, %p1303_p0 }
  0x2b   : > { %1144 = vmatpush3.bf16.msra.mxu1 %v1225_v24  ;;  %p1299_p13 = pneg %p1298_p12 }
  0x2c   : > { %442 = vmatpush1.bf16.msra.mxu0 %v1226_v26  ;;  %1102 = vmatprep.subr.msk.bf16.mxu1 %vm743_vm1, %v1101_v59  ;;  %v295_v7 = vrot.slane %v282_v3, %v294_v2  ;;  %v287_v8 = vrot.slane %v282_v3, %v286_v4  ;;  %v291_v9 = vrot.slane %v282_v3, %v290_v6 }
  0x2d   : > { %750 = vmatprep.subr.bf16.mxu0 %v1229_v27  ;;  %p1306_p3 = pnand %p1305_p2, %p1299_p13 }
  0x2e   : > { %1146 = vmatmul.mubr.bf16.vlgmr.msra.gmra.mrb[0].mxu1 %v249_v28 }
  0x2f   : > { %460 = vmatmul.mubr.bf16.vlgmr.msra.gmra.mrb[0].mxu0 %v249_v28  ;;  %823 = vmatprep.mubr.bf16.mxu1 %v1362_v5 }
  0x30   : > { %751 = vmatpush1.bf16.msra.mxu0 %v1227_v29  ;;  %792 = vmatpush1.bf16.msra.mxu1 %v745_v61 }
  0x31   : > { %752 = vmatprep.subr.bf16.mxu0 %v1232_v30  ;;  %920 = vmatprep.subr.bf16.mxu1 %v1362_v5 }
  0x34   : > { %753 = vmatpush1.bf16.msra.mxu0 %v1230_v31 }
  0x35   : > { %754 = vmatprep.subr.bf16.mxu0 %v1235_v32 }
  0x38   : > { %755 = vmatpush1.bf16.msra.mxu0 %v1233_v33 }
  0x39   : > { %756 = vmatprep.subr.bf16.mxu0 %v1238_v34  ;;  %v1277_v34 = vld [vmem:[%s1737_s5] sm:$0xff]  }
  0x3c   : > { %757 = vmatpush1.bf16.msra.mxu0 %v1236_v35 }
  0x3d   : > { %758 = vmatprep.subr.bf16.mxu0 %v1241_v36 }
  0x40   : > { %759 = vmatpush1.bf16.msra.mxu0 %v1239_v37 }
  0x41   : > { %760 = vmatprep.subr.bf16.mxu0 %v1244_v38 }
  0x44   : > { %761 = vmatpush1.bf16.msra.mxu0 %v1242_v39 }
  0x45   : > { %762 = vmatprep.subr.bf16.mxu0 %v1247_v40  ;;  %v1278_v40 = vld [vmem:[%s1737_s5 + $0x8] sm:$0xff]  }
  0x48   : > { %763 = vmatpush1.bf16.msra.mxu0 %v1245_v41  ;;  %v1279_v41 = vld [vmem:[%s1737_s5 + $0x10] sm:$0xff]  }
  0x49   : > { %764 = vmatprep.subr.bf16.mxu0 %v1250_v42  ;;  %v1280_v42 = vld [vmem:[%s1737_s5 + $0x18] sm:$0xff]  }
  0x4c   : > { %765 = vmatpush1.bf16.msra.mxu0 %v1248_v43  ;;  %v1281_v43 = vld [vmem:[%s1737_s5 + $0x20] sm:$0xff]  }
  0x4d   : > { %766 = vmatprep.subr.bf16.mxu0 %v1253_v44  ;;  %v1282_v44 = vld [vmem:[%s1737_s5 + $0x28] sm:$0xff]  }
  0x50   : > { %767 = vmatpush1.bf16.msra.mxu0 %v1251_v45  ;;  %v1283_v45 = vld [vmem:[%s1737_s5 + $0x30] sm:$0xff]  }
  0x51   : > { %768 = vmatprep.subr.bf16.mxu0 %v1256_v46  ;;  %v1284_v46 = vld [vmem:[%s1737_s5 + $0x38] sm:$0xff]  }
  0x54   : > { %769 = vmatpush1.bf16.msra.mxu0 %v1254_v47  ;;  %v1285_v47 = vld [vmem:[%s1737_s5 + $0x40] ss:$0 sps:$4 sm:$0xff]  }
  0x55   : > { %770 = vmatprep.subr.bf16.mxu0 %v1259_v48  ;;  %v918_v48 = vsel %vm743_vm1, %v1285_v47, 0 }
  0x58   : > { %771 = vmatpush1.bf16.msra.mxu0 %v1257_v49  ;;  %v562_v49 = vld [vmem:[%s1736_s4] sm:$0x3] }
  0x59   : > { %772 = vmatprep.subr.bf16.mxu0 %v1262_v50 }
  0x5c   : > { %773 = vmatpush1.bf16.msra.mxu0 %v1260_v51  ;;  %v567_v51 = vrot.slane %v562_v49, %v286_v4 }
  0x5d   : > { %774 = vmatprep.subr.bf16.mxu0 %v1265_v52 }
  0x60   : > { %775 = vmatpush1.bf16.msra.mxu0 %v1263_v53  ;;  %v571_v53 = vrot.slane %v562_v49, %v290_v6 }
  0x61   : > { %776 = vmatprep.subr.bf16.mxu0 %v1268_v54 }
  0x64   : > { %777 = vmatpush1.bf16.msra.mxu0 %v1266_v55 }
  0x65   : > { %778 = vmatprep.subr.bf16.mxu0 %v1271_v56 }
  0x68   : > { %779 = vmatpush1.bf16.msra.mxu0 %v1269_v58 }
  0x69   : > { %780 = vmatprep.subr.bf16.mxu0 %v1276_v62 }
  0x6c   : > { %781 = vmatpush1.bf16.msra.mxu0 %v1274_v63 }
 0x101   : > { %v502_v10 = vpop.f32.mrb[0].mxu1 }
 0x102   : > { %v503_v11 = vadd.f32 %v502_v10, %v295_v7  ;;  %v461_v12 = vpop.f32.mrb[0].mxu0  ;;  %v1147_v13 = vpop.f32.mrb[1].mxu1 }
 0x103   : > { %v462_v14 = vadd.f32 %v461_v12, %v287_v8  ;;  %v463_v15 = vpop.f32.mrb[1].mxu0  ;;  %v505_v16 = vpop.f32.mrb[2].mxu1 }
 0x104   : > { %v513_v17 = vmin.f32 %v503_v11, 0.0  ;;  %v464_v18 = vadd.f32 %v463_v15, %v291_v9  ;;  %v465_v19 = vpop.f32.mrb[2].mxu0  ;;  %v1148_v20 = vpop.f32.mrb[3].mxu1  ;;  %vm510_vm2 = vcmp.gt.f32.partialorder %v503_v11, 0.0 }
 0x105   : > { %v511_v21 = vmin.f32 %v462_v14, 0.0  ;;  %v466_v22 = vpop.f32.mrb[3].mxu0  ;;  %vm508_vm3 = vcmp.gt.f32.partialorder %v462_v14, 0.0 }
 0x106   : > { %v518_v23 = vmul.f32 1.442695, %v513_v17  ;;  %v512_v24 = vmin.f32 %v464_v18, 0.0  ;;  %vm509_vm5 = vcmp.gt.f32.partialorder %v464_v18, 0.0 }
 0x107   : > { %v514_v25 = vmul.f32 1.442695, %v511_v21 }
 0x108   : > { %1286 = vpow2.f32 %v518_v23  ;;  %v516_v26 = vmul.f32 1.442695, %v512_v24 }
 0x109   : > { %1288 = vpow2.f32 %v514_v25 }
 0x10a   : > { %1290 = vpow2.f32 %v516_v26 }
 0x112   : > { %v1287_v27 = vpop.eup %1286 }
 0x113   : > { %v1289_v28 = vpop.eup %1288  ;;  %v1067_v29 = vadd.f32 -1.0, %v1287_v27 }
 0x114   : > { %v1291_v30 = vpop.eup %1290  ;;  %v1065_v31 = vadd.f32 -1.0, %v1289_v28 }
 0x115   : > { %v525_v32 = vsel %vm510_vm2, %v503_v11, %v1067_v29  ;;  %v1066_v33 = vadd.f32 -1.0, %v1291_v30 }
 0x116   : > { %v528_v35 = vpack.c.bf16 %v525_v32, %v525_v32  ;;  %v523_v36 = vsel %vm508_vm3, %v462_v14, %v1065_v31 }
 0x117   : > { %v524_v37 = vsel %vm509_vm5, %v464_v18, %v1066_v33  ;;  %v526_v39 = vpack.c.bf16 %v523_v36, %v523_v36 }
 0x118   : > { %1103 = vmatmul.mubr.msk.bf16.vlgmr.msra.gmra.mrb[4].mxu1 %vm739_vm4, %v528_v35  ;;  %v527_v38 = vpack.c.bf16 %v524_v37, %v524_v37 }
 0x119   : > { %921 = vmatpush1.bf16.msra.mxu1 %v1277_v34 }
 0x11a   : > { %782 = vmatprep.mubr.bf16.mxu0 %v527_v38  ;;  %922 = vmatprep.subr.bf16.mxu1 %v1362_v5 }
 0x11b   : > { %783 = vmatmul.mubr.bf16.vlgmr.msra.gmra.mrb[4].mxu0 %v526_v39 }
 0x11d   : > { %923 = vmatpush1.bf16.msra.mxu1 %v1278_v40 }
 0x11e   : > { %924 = vmatprep.subr.bf16.mxu1 %v1362_v5 }
 0x121   : > { %925 = vmatpush1.bf16.msra.mxu1 %v1279_v41 }
 0x122   : > { %926 = vmatprep.subr.bf16.mxu1 %v1362_v5 }
 0x125   : > { %927 = vmatpush1.bf16.msra.mxu1 %v1280_v42 }
 0x126   : > { %928 = vmatprep.subr.bf16.mxu1 %v1362_v5 }
 0x129   : > { %929 = vmatpush1.bf16.msra.mxu1 %v1281_v43 }
 0x12a   : > { %930 = vmatprep.subr.bf16.mxu1 %v1362_v5 }
 0x12d   : > { %931 = vmatpush1.bf16.msra.mxu1 %v1282_v44 }
 0x12e   : > { %932 = vmatprep.subr.bf16.mxu1 %v1362_v5 }
 0x131   : > { %933 = vmatpush1.bf16.msra.mxu1 %v1283_v45 }
 0x132   : > { %934 = vmatprep.subr.bf16.mxu1 %v1362_v5 }
 0x135   : > { %935 = vmatpush1.bf16.msra.mxu1 %v1284_v46 }
 0x136   : > { %936 = vmatprep.subr.bf16.mxu1 %v1362_v5 }
 0x139   : > { %937 = vmatpush1.bf16.msra.mxu1 %v918_v48 }
 0x1eb   : > { %v825_v50 = vpop.f32.mrb[4].mxu1 }
 0x1ec   : > { %v827_v52 = vpop.f32.mrb[5].mxu1 }
 0x1ed   : > { %v829_v5 = vpop.f32.mrb[6].mxu1 }
 0x1ee   : > { %v784_v54 = vpop.f32.mrb[4].mxu0  ;;  %v830_v55 = vpop.f32.mrb[7].mxu1 }
 0x1ef   : > { %v785_v56 = vadd.f32 %v784_v54, %v567_v51  ;;  %v786_v57 = vpop.f32.mrb[5].mxu0 }
 0x1f0   : > { %v787_v58 = vadd.f32 %v786_v57, %v571_v53  ;;  %v788_v59 = vpop.f32.mrb[6].mxu0 }
 0x1f1   : > { %v826_v60 = vadd.f32 %v825_v50, %v785_v56  ;;  %v789_v61 = vpop.f32.mrb[7].mxu0 }
 0x1f2   : > { %v828_v62 = vadd.f32 %v827_v52, %v787_v58 }
 0x1f3   : > { %v834_v63 = vmin.f32 %v826_v60, 0.0  ;;  %vm832_vm6 = vcmp.gt.f32.partialorder %v826_v60, 0.0 }
 0x1f4   : > { %v835_v0 = vmin.f32 %v828_v62, 0.0  ;;  %vm833_vm7 = vcmp.gt.f32.partialorder %v828_v62, 0.0 }
 0x1f5   : > { %v836_v2 = vmul.f32 1.442695, %v834_v63 }
 0x1f6   : > { %v838_v3 = vmul.f32 1.442695, %v835_v0 }
 0x1f7   : > { %1292 = vpow2.f32 %v836_v2 }
 0x1f8   : > { %1294 = vpow2.f32 %v838_v3 }
 0x201   : > { %v1293_v1 = vpop.eup %1292 }
 0x202   : > { %v1295_v4 = vpop.eup %1294  ;;  %v1104_v6 = vadd.f32 -1.0, %v1293_v1 }
 0x203   : > { %v1105_v7 = vadd.f32 -1.0, %v1295_v4 }
 0x204   : > { %v842_v8 = vsel %vm832_vm6, %v826_v60, %v1104_v6 }
 0x205   : > { %v843_v9 = vsel %vm833_vm7, %v828_v62, %v1105_v7  ;;  %v844_v11 = vpack.c.bf16 %v842_v8, %v842_v8 }
 0x206   : > { %v845_v10 = vpack.c.bf16 %v843_v9, %v843_v9 }
 0x208   : > { %1115 = vmatprep.mubr.msk.bf16.mxu1 %vm739_vm4, %v845_v10 }
 0x209   : > { %953 = vmatmul.mubr.bf16.vlgmr.msra.gmra.mrb[8].mxu1 %v844_v11 }
 0x2dc   : > { %v954_v12 = vpop.f32.mrb[8].mxu1 }
 0x2dd   : > { %961 = vst.msk [vmem:[%s242_s18] sm:$0xff] %vm960_vm8, %v954_v12  ;;  %v956_v13 = vpop.f32.mrb[9].mxu1 }
 0x2de   : > { %v957_v14 = vpop.f32.mrb[10].mxu1 }
 0x2df   : > { %1309 = shalt.err (!%p1306_p3)
}
 0x2e0   : > { %s1310_s13 = scalar_lea.hbm %s1690_s28, 128  ;;  %s1314_s15 = scalar_lea.hbm %s1738_s6, 256 }
 0x2e1   : > { %p1311_p4 = scmp.ne.s32.totalorder %s1690_s28, %s1310_s13  ;;  %p1315_p9 = scmp.lt.u32.totalorder %s1690_s28, %s1738_s6 }
 0x2e2   : > { %p1316_p10 = scmp.lt.u32.totalorder %s1314_s15, %s1310_s13  ;;  %p1318_p12 = scmp.lt.u32.totalorder %s1310_s13, %s1690_s28 }
 0x2e3   : > { %p1312_p7 = pnand %p1311_p4, %p1437_p5 }
 0x2e4   : > { %p1317_p11 = por %p1316_p10, %p1315_p9 }
 0x2e5   : > { %p1313_p8 = pneg %p1312_p7 }
 0x2e6   : > { %p1319_p13 = por %p1318_p12, %p1317_p11 }
 0x2e8   : > { %p1320_p0 = pnand %p1319_p13, %p1313_p8 }
 0x2ea   : > { %1323 = shalt.err (!%p1320_p0)
}
 0x2eb   : > { %1153 = dma.vmem_to_hbm [thread:$0]  (%p1437_p5), %s1692_s19, 128, %s1690_s28, %s963_s29   ;;  %v958_v15 = vpop.f32.mrb[11].mxu1 }
 0x2ec PF: > { %p1159_p1 = scmp.ge.s32.totalorder %s1358_s24, 2  ;;  %s988_s18 = sand.u32 1, %s1346_s21  }
 0x2ed   : > { %s989_s20 = scalar_lea.sflag [#allocation3], %s988_s18 }
 0x2ee   : > { %p1156_p2 = pnand %p1159_p1, %p1441_p6 }
 0x2f0   : > { %1341 = dma.done.wait (!%p1156_p2), %s989_s20, 128  }
 0x2f1   : > { %1343 = vsyncadd (!%p1156_p2), %s989_s20, 4294967168  ;;  %p16_p3 = scmp.ge.s32.totalorder %s1424_s27, 4   ;;  %s1741_s21 = smov %s1350_s22 }
 0x2f2   : > { %s1742_s22 = smov %s1354_s23  ;;  %s1743_s23 = smov %s1435_s30 }
 0x2f3   : > { %s1744_s24 = smov %s1424_s27  ;;  %18 = sbr.rel (!%p16_p3) target bundleno = 3 (0x3), region = 79 }
 0x2fa   :  { %994 = vsyncpa [#allocation3], 1 }
 0x2fb   :  { %996 = vsyncpa [#allocation3 + $0x1], 1 }

</bundles_post_ra>
